<compile_context>
chip_gen: v6e
topology: v6e:2x2x1
jax: 0.10.0
libtpu: 0.0.40
codegen_flags: <defaults>
</compile_context>

<pallas_src>
import functools

import jax
import jax.numpy as jnp
from jax.experimental import pallas as pl
from jax.experimental.pallas import tpu as pltpu

LANE = 128


def _round_up(n, m):
    return ((n + m - 1) // m) * m


def _silu(h):
    # exp + approximate reciprocal both execute on the EUP slot, leaving the
    # VALU slots for the surrounding adds/muls (v5e has no bf16 VPU/EUP and
    # only 4 f32 VALU slots, so this matters most there).
    return h * pl.reciprocal(1.0 + jnp.exp(-h), approx=True)


# ---------------------------------------------------------------------------
# Kernels
# ---------------------------------------------------------------------------
def _mlp_resident_kernel(*refs, num_hidden_layers):
    """Whole MLP on one batch tile; all weights VMEM-resident.

    refs (num_hidden_layers > 1):
      x(TB,Din) w_in(Din,Hp) b_in(1,Hp) w_hid(L-1,Hp,Hp) b_hid(L-1,1,Hp)
      w_out(Hp,Dp) b_out(1,Dp) out(TB,Dp)
    refs (num_hidden_layers == 1): same but without w_hid / b_hid.
    """
    if num_hidden_layers > 1:
        (x_ref, w_in_ref, b_in_ref, w_hid_ref, b_hid_ref,
         w_out_ref, b_out_ref, o_ref) = refs
    else:
        x_ref, w_in_ref, b_in_ref, w_out_ref, b_out_ref, o_ref = refs
        w_hid_ref = b_hid_ref = None

    h = jnp.dot(x_ref[...].astype(jnp.bfloat16), w_in_ref[...],
                preferred_element_type=jnp.float32) + b_in_ref[...]
    h = _silu(h)
    for l in range(num_hidden_layers - 1):     # small compile-time unroll
        h = jnp.dot(h.astype(jnp.bfloat16), w_hid_ref[l],
                    preferred_element_type=jnp.float32) + b_hid_ref[l]
        h = _silu(h)
    y = jnp.dot(h.astype(jnp.bfloat16), w_out_ref[...],
                preferred_element_type=jnp.float32) + b_out_ref[...]
    o_ref[...] = y.astype(o_ref.dtype)


def _mlp_streaming_kernel(x_ref, w_in_ref, b_in_ref, w_hid_ref, b_hid_ref,
                          w_out_ref, b_out_ref, o_ref, h_ref):
    """One hidden layer per grid step along axis 1 ("arbitrary").

    Only one (1,Hp,Hp) hidden-weight slab is VMEM-resident at a time (the
    pipeline double-buffers the next layer's slab behind the current matmul),
    so deep/wide stacks fit v7x's 64 MiB/TC.  The running activation lives in
    the `h_ref` VMEM scratch, which persists across grid steps.
    """
    l = pl.program_id(1)

    @pl.when(l == 0)
    def _():                                   # input layer + SiLU
        h0 = jnp.dot(x_ref[...].astype(jnp.bfloat16), w_in_ref[...],
                     preferred_element_type=jnp.float32) + b_in_ref[...]
        h_ref[...] = _silu(h0)

    h = jnp.dot(h_ref[...].astype(jnp.bfloat16), w_hid_ref[0],
                preferred_element_type=jnp.float32) + b_hid_ref[0]
    h_ref[...] = _silu(h)

    @pl.when(l == pl.num_programs(1) - 1)
    def _():                                   # linear output layer
        y = jnp.dot(h_ref[...].astype(jnp.bfloat16), w_out_ref[...],
                    preferred_element_type=jnp.float32) + b_out_ref[...]
        o_ref[...] = y.astype(o_ref.dtype)


# ---------------------------------------------------------------------------
# Parameters
# ---------------------------------------------------------------------------
def init_params(key, input_dim, hidden_dim, num_hidden_layers):
    """Xavier-uniform weights (same bound as torch.nn.init.xavier_uniform_),
    zero biases.  Weights stored as (in, out)."""
    def xavier(k, fan_in, fan_out):
        bound = (6.0 / (fan_in + fan_out)) ** 0.5
        return jax.random.uniform(k, (fan_in, fan_out), jnp.float32,
                                  minval=-bound, maxval=bound)

    n_hid = num_hidden_layers - 1
    keys = jax.random.split(key, 2 + max(n_hid, 1))

    w_in = xavier(keys[0], input_dim, hidden_dim)
    b_in = jnp.zeros((1, hidden_dim), jnp.float32)
    if n_hid > 0:
        w_hid = jnp.stack([xavier(keys[1 + l], hidden_dim, hidden_dim)
                           for l in range(n_hid)], axis=0)
    else:
        w_hid = jnp.zeros((0, hidden_dim, hidden_dim), jnp.float32)
    b_hid = jnp.zeros((n_hid, 1, hidden_dim), jnp.float32)
    w_out = xavier(keys[-1], hidden_dim, input_dim)
    b_out = jnp.zeros((1, input_dim), jnp.float32)
    return (w_in, b_in, w_hid, b_hid, w_out, b_out)


def prepare_params(params):
    """One-time lane-pad + bf16 cast of the weights (hoisted out of the
    per-call path).  Zero padding is exact: SiLU(0)==0 and padded rows/cols
    are sliced off after the kernel."""
    w_in, b_in, w_hid, b_hid, w_out, b_out = params
    Din, H = w_in.shape
    Lm1 = int(w_hid.shape[0])
    Hp = _round_up(H, LANE)
    Dp = _round_up(Din, LANE)
    bf = jnp.bfloat16
    prep = {
        "Din": Din, "H": H, "Lm1": Lm1, "Hp": Hp, "Dp": Dp,
        # x / w_in keep the true Din contraction dim (no padding of the input
        # features); only hidden / output feature dims are lane-padded.
        "w_in": jnp.zeros((Din, Hp), bf).at[:, :H].set(w_in.astype(bf)),
        "b_in": jnp.zeros((1, Hp), jnp.float32)
                  .at[:, :H].set(jnp.asarray(b_in, jnp.float32).reshape(1, H)),
        "w_out": jnp.zeros((Hp, Dp), bf).at[:H, :Din].set(w_out.astype(bf)),
        "b_out": jnp.zeros((1, Dp), jnp.float32)
                   .at[:, :Din].set(jnp.asarray(b_out, jnp.float32).reshape(1, Din)),
        "w_hid": None, "b_hid": None,
    }
    if Lm1 > 0:
        prep["w_hid"] = (jnp.zeros((Lm1, Hp, Hp), bf)
                         .at[:, :H, :H].set(w_hid.astype(bf)))
        prep["b_hid"] = (jnp.zeros((Lm1, 1, Hp), jnp.float32)
                         .at[:, :, :H]
                         .set(jnp.asarray(b_hid, jnp.float32).reshape(Lm1, 1, H)))
    return prep


# ---------------------------------------------------------------------------
# Forward
# ---------------------------------------------------------------------------
def nn_forward(t, x, prepared, *, block_batch=512, stream_hidden=None):
    """Matches NN.forward(t, x); `t` is ignored, like the PyTorch module.
    `prepared` comes from prepare_params()."""
    del t
    B, Din = x.shape
    assert Din == prepared["Din"], "input feature dim mismatch"
    Hp, Dp, Lm1 = prepared["Hp"], prepared["Dp"], prepared["Lm1"]
    num_layers = Lm1 + 1
    out_dtype = x.dtype if x.dtype in (jnp.float32, jnp.bfloat16) else jnp.float32
    x_bytes = x.dtype.itemsize
    o_bytes = jnp.dtype(out_dtype).itemsize

    # Weight footprints (bf16 weights, f32 biases).
    hid_bytes = Lm1 * (Hp * Hp * 2 + Hp * 4)
    const_bytes = Din * Hp * 2 + Hp * 4 + Hp * Dp * 2 + Dp * 4

    # Stream one hidden slab per layer when the full stack would eat a large
    # chunk of VMEM (v7x: only 64 MiB per TensorCore, one copy per TC).
    if stream_hidden is None:
        stream_hidden = hid_bytes > 24 * 1024 * 1024
    stream_hidden = bool(stream_hidden) and Lm1 >= 1

    def vmem_footprint(tb, weight_bufs):
        w = const_bytes * weight_bufs
        if Lm1 > 0:
            w += (2 * (Hp * Hp * 2 + Hp * 4) if stream_hidden
                  else hid_bytes * weight_bufs)
        tiles = 2 * tb * Din * x_bytes + 2 * tb * Dp * o_bytes  # dbl-buffered
        acts = tb * Hp * (4 + 2) + tb * Dp * 4                  # h f32+bf16, y f32
        return w + tiles + acts

    # Batch tile: big (fewer ~0.35us grid steps, deeper MXU LHS stream), but
    # clamped to VMEM and kept small enough for >= 2 grid steps so both v7x
    # TensorCores get work on the "parallel" batch axis.
    Bp8 = _round_up(B, 8)
    TB = _round_up(min(block_batch, Bp8), 8)
    if Bp8 >= 16 and -(-Bp8 // TB) < 2:
        TB = _round_up(-(-Bp8 // 2), 8)
    VMEM_BUDGET = 48 * 1024 * 1024        # headroom under v7x's 64 MiB / TC
    while TB > 8 and vmem_footprint(TB, 2) > VMEM_BUDGET:
        TB = _round_up(TB // 2, 8)
    Bp = _round_up(B, TB)
    num_batch_tiles = Bp // TB

    # Per-call wrapper work touches x only (row-pad iff B % TB != 0).
    xp = x if Bp == B else jnp.zeros((Bp, Din), x.dtype).at[:B].set(x)

    # Raise the scoped-VMEM limit (defaults: 16 MiB v5e / 32 MiB v6e-v7x).
    vmem_limit = int(min(100 * 1024 * 1024,
                         max(int(vmem_footprint(TB, 2) * 1.3),
                             32 * 1024 * 1024)))

    flops = 2 * Bp * (Din * Hp + Lm1 * Hp * Hp + Hp * Dp)
    cost = pl.CostEstimate(
        flops=int(flops),
        transcendentals=int(Bp * Hp * num_layers),
        bytes_accessed=int(Bp * Din * x_bytes + Bp * Dp * o_bytes
                           + const_bytes + hid_bytes))

    def build_and_call(single_buffer_weights):
        # Constant-index weights: single buffering halves their VMEM footprint
        # (they are only DMA'd once anyway).
        kw = ({"pipeline_mode": pl.Buffered(1)}
              if single_buffer_weights else {})

        if stream_hidden:
            grid = (num_batch_tiles, Lm1)
            in_specs = [
                pl.BlockSpec((TB, Din), lambda i, l: (i, 0)),
                pl.BlockSpec((Din, Hp), lambda i, l: (0, 0), **kw),
                pl.BlockSpec((1, Hp), lambda i, l: (0, 0), **kw),
                pl.BlockSpec((1, Hp, Hp), lambda i, l: (l, 0, 0)),  # streamed
                pl.BlockSpec((1, 1, Hp), lambda i, l: (l, 0, 0)),   # streamed
                pl.BlockSpec((Hp, Dp), lambda i, l: (0, 0), **kw),
                pl.BlockSpec((1, Dp), lambda i, l: (0, 0), **kw),
            ]
            out_specs = pl.BlockSpec((TB, Dp), lambda i, l: (i, 0))
            scratch = [pltpu.VMEM((TB, Hp), jnp.float32)]
            args = (xp, prepared["w_in"], prepared["b_in"],
                    prepared["w_hid"], prepared["b_hid"],
                    prepared["w_out"], prepared["b_out"])
            kernel = _mlp_streaming_kernel
            dims = ("parallel", "arbitrary")
        else:
            grid = (num_batch_tiles,)
            in_specs = [
                pl.BlockSpec((TB, Din), lambda i: (i, 0)),
                pl.BlockSpec((Din, Hp), lambda i: (0, 0), **kw),
                pl.BlockSpec((1, Hp), lambda i: (0, 0), **kw),
            ]
            args = [xp, prepared["w_in"], prepared["b_in"]]
            if Lm1 > 0:
                in_specs += [
                    pl.BlockSpec((Lm1, Hp, Hp), lambda i: (0, 0, 0), **kw),
                    pl.BlockSpec((Lm1, 1, Hp), lambda i: (0, 0, 0), **kw),
                ]
                args += [prepared["w_hid"], prepared["b_hid"]]
            # num_hidden_layers == 1: no dummy hidden stack is passed / DMA'd.
            in_specs += [
                pl.BlockSpec((Hp, Dp), lambda i: (0, 0), **kw),
                pl.BlockSpec((1, Dp), lambda i: (0, 0), **kw),
            ]
            args += [prepared["w_out"], prepared["b_out"]]
            args = tuple(args)
            out_specs = pl.BlockSpec((TB, Dp), lambda i: (i, 0))
            scratch = []
            kernel = functools.partial(_mlp_resident_kernel,
                                       num_hidden_layers=num_layers)
            dims = ("parallel",)

        call = pl.pallas_call(
            kernel,
            out_shape=jax.ShapeDtypeStruct((Bp, Dp), out_dtype),
            grid_spec=pltpu.PrefetchScalarGridSpec(
                num_scalar_prefetch=0,
                grid=grid,
                in_specs=in_specs,
                out_specs=out_specs,
                scratch_shapes=scratch),
            compiler_params=pltpu.CompilerParams(
                dimension_semantics=dims,
                vmem_limit_bytes=vmem_limit),
            cost_estimate=cost,
        )
        return call(*args)

    try:
        out_p = build_and_call(single_buffer_weights=True)
    except Exception:
        # pl.Buffered(1) not accepted by this JAX/Mosaic version -> fall back
        # to default double buffering (identical results, slightly more VMEM).
        out_p = build_and_call(single_buffer_weights=False)

    return out_p[:B, :Din].astype(x.dtype)


# ---------------------------------------------------------------------------
# Reference + self-test
# ---------------------------------------------------------------------------
def reference_forward(x, params, num_hidden_layers):
    """Plain-JAX f32 reference for a sanity check."""
    w_in, b_in, w_hid, b_hid, w_out, b_out = params
    h = x @ w_in + b_in
    h = h * jax.nn.sigmoid(h)
    for l in range(num_hidden_layers - 1):
        h = h @ w_hid[l] + b_hid[l]
        h = h * jax.nn.sigmoid(h)
    return h @ w_out + b_out


if __name__ == "__main__":
    input_dim = 8
    hidden_dim = 32
    num_hidden_layers = 3
    batch = 256      # several batch tiles so the grid pipelines / both v7x TCs work

    key = jax.random.PRNGKey(0)
    k_param, k_x = jax.random.split(key)

    params = init_params(k_param, input_dim, hidden_dim, num_hidden_layers)
    prepared = prepare_params(params)            # pad + cast ONCE, not per call
    x = jax.random.normal(k_x, (batch, input_dim), jnp.float32)
    t = jnp.float32(0.0)                         # unused, mirrors forward(t, x)

    ref = reference_forward(x, params, num_hidden_layers)

    # 1) Default path: weights fully VMEM-resident for this small config.
    out = jax.block_until_ready(nn_forward(t, x, prepared))
    assert out.shape == (batch, input_dim) and out.dtype == x.dtype
    # bf16 weights/activations with f32 accumulation => loosened tolerance.
    assert jnp.allclose(out, ref, atol=5e-2, rtol=5e-2), (
        float(jnp.max(jnp.abs(out - ref))))

    # 2) Layer-streaming path (chosen automatically for large hidden stacks,
    #    e.g. to fit v7x's 64 MiB/TC VMEM); forced here to validate it too.
    out_s = jax.block_until_ready(nn_forward(t, x, prepared, stream_hidden=True))
    assert jnp.allclose(out_s, ref, atol=5e-2, rtol=5e-2), (
        float(jnp.max(jnp.abs(out_s - ref))))

    # 3) num_hidden_layers == 1: dummy hidden-weight operands are skipped.
    params1 = init_params(k_param, input_dim, hidden_dim, 1)
    prepared1 = prepare_params(params1)
    out1 = jax.block_until_ready(nn_forward(t, x, prepared1))
    ref1 = reference_forward(x, params1, 1)
    assert jnp.allclose(out1, ref1, atol=5e-2, rtol=5e-2), (
        float(jnp.max(jnp.abs(out1 - ref1))))

    print("KERNEL_OK")
</pallas_src>

<mosaic_0001>
module attributes {stable_mosaic.version = 11 : i64} {
  func.func @_mlp_resident_kernel(%arg0: i32, %arg1: memref<128x8xf32, #tpu.memory_space<vmem>>, %arg2: memref<8x128xbf16, #tpu.memory_space<vmem>>, %arg3: memref<1x128xf32, #tpu.memory_space<vmem>>, %arg4: memref<2x128x128xbf16, #tpu.memory_space<vmem>>, %arg5: memref<2x1x128xf32, #tpu.memory_space<vmem>>, %arg6: memref<128x128xbf16, #tpu.memory_space<vmem>>, %arg7: memref<1x128xf32, #tpu.memory_space<vmem>>, %arg8: memref<128x128xf32, #tpu.memory_space<vmem>>) attributes {dimension_semantics = [#tpu.dimension_semantics<parallel>], iteration_bounds = array<i64: 2>, scalar_prefetch = 0 : i64, scratch_operands = 0 : i64, tpu.core_type = #tpu.core_type<tc>, window_params = [{transform_indices = @transform_0, window_bounds = array<i64: 128, 8>}, {pipeline_mode = #tpu.pipeline_mode<synchronous>, transform_indices = @transform_1, window_bounds = array<i64: 8, 128>}, {pipeline_mode = #tpu.pipeline_mode<synchronous>, transform_indices = @transform_2, window_bounds = array<i64: 1, 128>}, {pipeline_mode = #tpu.pipeline_mode<synchronous>, transform_indices = @transform_3, window_bounds = array<i64: 2, 128, 128>}, {pipeline_mode = #tpu.pipeline_mode<synchronous>, transform_indices = @transform_4, window_bounds = array<i64: 2, 1, 128>}, {pipeline_mode = #tpu.pipeline_mode<synchronous>, transform_indices = @transform_5, window_bounds = array<i64: 128, 128>}, {pipeline_mode = #tpu.pipeline_mode<synchronous>, transform_indices = @transform_6, window_bounds = array<i64: 1, 128>}, {transform_indices = @transform_7, window_bounds = array<i64: 128, 128>}]} {
    %c0 = arith.constant 0 : index
    %c0_0 = arith.constant 0 : index
    %0 = vector.load %arg1[%c0, %c0_0] : memref<128x8xf32, #tpu.memory_space<vmem>>, vector<128x8xf32>
    %1 = arith.truncf %0 : vector<128x8xf32> to vector<128x8xbf16>
    %c0_1 = arith.constant 0 : index
    %c0_2 = arith.constant 0 : index
    %2 = vector.load %arg2[%c0_1, %c0_2] : memref<8x128xbf16, #tpu.memory_space<vmem>>, vector<8x128xbf16>
    %cst = arith.constant dense<0.000000e+00> : vector<128x128xf32>
    %3 = tpu.matmul %1, %2, %cst {dimension_numbers = #tpu.dot_dimension_numbers<[1], [0], [0], [1], [0, 0, 1, 1], [], []>} : vector<128x8xbf16>, vector<8x128xbf16>, vector<128x128xf32> -> vector<128x128xf32>
    %c0_3 = arith.constant 0 : index
    %c0_4 = arith.constant 0 : index
    %4 = vector.load %arg3[%c0_3, %c0_4] : memref<1x128xf32, #tpu.memory_space<vmem>>, vector<1x128xf32>
    %5 = vector.broadcast %4 : vector<1x128xf32> to vector<128x128xf32>
    %6 = arith.addf %3, %5 : vector<128x128xf32>
    %cst_5 = arith.constant 0.000000e+00 : f32
    %7 = vector.broadcast %cst_5 : f32 to vector<128x128xf32>
    %8 = arith.subf %7, %6 : vector<128x128xf32>
    %9 = math.exp %8 : vector<128x128xf32>
    %cst_6 = arith.constant 1.000000e+00 : f32
    %10 = vector.broadcast %cst_6 : f32 to vector<128x128xf32>
    %11 = arith.addf %10, %9 : vector<128x128xf32>
    %12 = tpu.reciprocal %11 {approx = true} : vector<128x128xf32> -> vector<128x128xf32>
    %13 = arith.mulf %6, %12 : vector<128x128xf32>
    %14 = arith.truncf %13 : vector<128x128xf32> to vector<128x128xbf16>
    %c0_7 = arith.constant 0 : index
    %c0_8 = arith.constant 0 : index
    %c0_9 = arith.constant 0 : index
    %15 = vector.load %arg4[%c0_7, %c0_8, %c0_9] : memref<2x128x128xbf16, #tpu.memory_space<vmem>>, vector<1x128x128xbf16>
    %16 = vector.shape_cast %15 : vector<1x128x128xbf16> to vector<128x128xbf16>
    %cst_10 = arith.constant dense<0.000000e+00> : vector<128x128xf32>
    %17 = tpu.matmul %14, %16, %cst_10 {dimension_numbers = #tpu.dot_dimension_numbers<[1], [0], [0], [1], [0, 0, 1, 1], [], []>} : vector<128x128xbf16>, vector<128x128xbf16>, vector<128x128xf32> -> vector<128x128xf32>
    %c0_11 = arith.constant 0 : index
    %c0_12 = arith.constant 0 : index
    %c0_13 = arith.constant 0 : index
    %18 = vector.load %arg5[%c0_11, %c0_12, %c0_13] : memref<2x1x128xf32, #tpu.memory_space<vmem>>, vector<1x1x128xf32>
    %19 = vector.shape_cast %18 : vector<1x1x128xf32> to vector<1x128xf32>
    %20 = vector.broadcast %19 : vector<1x128xf32> to vector<128x128xf32>
    %21 = arith.addf %17, %20 : vector<128x128xf32>
    %cst_14 = arith.constant 0.000000e+00 : f32
    %22 = vector.broadcast %cst_14 : f32 to vector<128x128xf32>
    %23 = arith.subf %22, %21 : vector<128x128xf32>
    %24 = math.exp %23 : vector<128x128xf32>
    %cst_15 = arith.constant 1.000000e+00 : f32
    %25 = vector.broadcast %cst_15 : f32 to vector<128x128xf32>
    %26 = arith.addf %25, %24 : vector<128x128xf32>
    %27 = tpu.reciprocal %26 {approx = true} : vector<128x128xf32> -> vector<128x128xf32>
    %28 = arith.mulf %21, %27 : vector<128x128xf32>
    %29 = arith.truncf %28 : vector<128x128xf32> to vector<128x128xbf16>
    %c1 = arith.constant 1 : index
    %c0_16 = arith.constant 0 : index
    %c0_17 = arith.constant 0 : index
    %30 = vector.load %arg4[%c1, %c0_16, %c0_17] : memref<2x128x128xbf16, #tpu.memory_space<vmem>>, vector<1x128x128xbf16>
    %31 = vector.shape_cast %30 : vector<1x128x128xbf16> to vector<128x128xbf16>
    %cst_18 = arith.constant dense<0.000000e+00> : vector<128x128xf32>
    %32 = tpu.matmul %29, %31, %cst_18 {dimension_numbers = #tpu.dot_dimension_numbers<[1], [0], [0], [1], [0, 0, 1, 1], [], []>} : vector<128x128xbf16>, vector<128x128xbf16>, vector<128x128xf32> -> vector<128x128xf32>
    %c1_19 = arith.constant 1 : index
    %c0_20 = arith.constant 0 : index
    %c0_21 = arith.constant 0 : index
    %33 = vector.load %arg5[%c1_19, %c0_20, %c0_21] : memref<2x1x128xf32, #tpu.memory_space<vmem>>, vector<1x1x128xf32>
    %34 = vector.shape_cast %33 : vector<1x1x128xf32> to vector<1x128xf32>
    %35 = vector.broadcast %34 : vector<1x128xf32> to vector<128x128xf32>
    %36 = arith.addf %32, %35 : vector<128x128xf32>
    %cst_22 = arith.constant 0.000000e+00 : f32
    %37 = vector.broadcast %cst_22 : f32 to vector<128x128xf32>
    %38 = arith.subf %37, %36 : vector<128x128xf32>
    %39 = math.exp %38 : vector<128x128xf32>
    %cst_23 = arith.constant 1.000000e+00 : f32
    %40 = vector.broadcast %cst_23 : f32 to vector<128x128xf32>
    %41 = arith.addf %40, %39 : vector<128x128xf32>
    %42 = tpu.reciprocal %41 {approx = true} : vector<128x128xf32> -> vector<128x128xf32>
    %43 = arith.mulf %36, %42 : vector<128x128xf32>
    %44 = arith.truncf %43 : vector<128x128xf32> to vector<128x128xbf16>
    %c0_24 = arith.constant 0 : index
    %c0_25 = arith.constant 0 : index
    %45 = vector.load %arg6[%c0_24, %c0_25] : memref<128x128xbf16, #tpu.memory_space<vmem>>, vector<128x128xbf16>
    %cst_26 = arith.constant dense<0.000000e+00> : vector<128x128xf32>
    %46 = tpu.matmul %44, %45, %cst_26 {dimension_numbers = #tpu.dot_dimension_numbers<[1], [0], [0], [1], [0, 0, 1, 1], [], []>} : vector<128x128xbf16>, vector<128x128xbf16>, vector<128x128xf32> -> vector<128x128xf32>
    %c0_27 = arith.constant 0 : index
    %c0_28 = arith.constant 0 : index
    %47 = vector.load %arg7[%c0_27, %c0_28] : memref<1x128xf32, #tpu.memory_space<vmem>>, vector<1x128xf32>
    %48 = vector.broadcast %47 : vector<1x128xf32> to vector<128x128xf32>
    %49 = arith.addf %46, %48 : vector<128x128xf32>
    %c0_29 = arith.constant 0 : index
    %c0_30 = arith.constant 0 : index
    %50 = vector.load %arg8[%c0_29, %c0_30] : memref<128x128xf32, #tpu.memory_space<vmem>>, vector<128x128xf32>
    tpu.vector_store %arg8[%c0_29, %c0_30], %49 {strides = array<i32>} : memref<128x128xf32, #tpu.memory_space<vmem>>, vector<128x128xf32>,
    return
  }
  func.func @transform_0(%arg0: i32) -> (i32, i32) {
    %c0_i32 = arith.constant 0 : i32
    %c0_i32_0 = arith.constant 0 : i32
    return %arg0, %c0_i32 : i32, i32
  }
  func.func @transform_1(%arg0: i32) -> (i32, i32) {
    %c0_i32 = arith.constant 0 : i32
    %c0_i32_0 = arith.constant 0 : i32
    %c0_i32_1 = arith.constant 0 : i32
    return %c0_i32, %c0_i32_0 : i32, i32
  }
  func.func @transform_2(%arg0: i32) -> (i32, i32) {
    %c0_i32 = arith.constant 0 : i32
    %c0_i32_0 = arith.constant 0 : i32
    %c0_i32_1 = arith.constant 0 : i32
    return %c0_i32, %c0_i32_0 : i32, i32
  }
  func.func @transform_3(%arg0: i32) -> (i32, i32, i32) {
    %c0_i32 = arith.constant 0 : i32
    %c0_i32_0 = arith.constant 0 : i32
    %c0_i32_1 = arith.constant 0 : i32
    %c0_i32_2 = arith.constant 0 : i32
    return %c0_i32, %c0_i32_0, %c0_i32_1 : i32, i32, i32
  }
  func.func @transform_4(%arg0: i32) -> (i32, i32, i32) {
    %c0_i32 = arith.constant 0 : i32
    %c0_i32_0 = arith.constant 0 : i32
    %c0_i32_1 = arith.constant 0 : i32
    %c0_i32_2 = arith.constant 0 : i32
    return %c0_i32, %c0_i32_0, %c0_i32_1 : i32, i32, i32
  }
  func.func @transform_5(%arg0: i32) -> (i32, i32) {
    %c0_i32 = arith.constant 0 : i32
    %c0_i32_0 = arith.constant 0 : i32
    %c0_i32_1 = arith.constant 0 : i32
    return %c0_i32, %c0_i32_0 : i32, i32
  }
  func.func @transform_6(%arg0: i32) -> (i32, i32) {
    %c0_i32 = arith.constant 0 : i32
    %c0_i32_0 = arith.constant 0 : i32
    %c0_i32_1 = arith.constant 0 : i32
    return %c0_i32, %c0_i32_0 : i32, i32
  }
  func.func @transform_7(%arg0: i32) -> (i32, i32) {
    %c0_i32 = arith.constant 0 : i32
    %c0_i32_0 = arith.constant 0 : i32
    return %arg0, %c0_i32 : i32, i32
  }
}

module attributes {stable_mosaic.version = 11 : i64} {
  func.func @_mlp_resident_kernel(%arg0: i32, %arg1: memref<128x8xf32, #tpu.memory_space<vmem>>, %arg2: memref<8x128xbf16, #tpu.memory_space<vmem>>, %arg3: memref<1x128xf32, #tpu.memory_space<vmem>>, %arg4: memref<2x128x128xbf16, #tpu.memory_space<vmem>>, %arg5: memref<2x1x128xf32, #tpu.memory_space<vmem>>, %arg6: memref<128x128xbf16, #tpu.memory_space<vmem>>, %arg7: memref<1x128xf32, #tpu.memory_space<vmem>>, %arg8: memref<128x128xf32, #tpu.memory_space<vmem>>) attributes {dimension_semantics = [#tpu.dimension_semantics<parallel>], iteration_bounds = array<i64: 2>, scalar_prefetch = 0 : i64, scratch_operands = 0 : i64, tpu.core_type = #tpu.core_type<tc>, window_params = [{transform_indices = @transform_0, window_bounds = array<i64: 128, 8>}, {pipeline_mode = #tpu.pipeline_mode<synchronous>, transform_indices = @transform_1, window_bounds = array<i64: 8, 128>}, {pipeline_mode = #tpu.pipeline_mode<synchronous>, transform_indices = @transform_2, window_bounds = array<i64: 1, 128>}, {pipeline_mode = #tpu.pipeline_mode<synchronous>, transform_indices = @transform_3, window_bounds = array<i64: 2, 128, 128>}, {pipeline_mode = #tpu.pipeline_mode<synchronous>, transform_indices = @transform_4, window_bounds = array<i64: 2, 1, 128>}, {pipeline_mode = #tpu.pipeline_mode<synchronous>, transform_indices = @transform_5, window_bounds = array<i64: 128, 128>}, {pipeline_mode = #tpu.pipeline_mode<synchronous>, transform_indices = @transform_6, window_bounds = array<i64: 1, 128>}, {transform_indices = @transform_7, window_bounds = array<i64: 128, 128>}]} {
    %c0 = arith.constant 0 : index
    %c0_0 = arith.constant 0 : index
    %0 = vector.load %arg1[%c0, %c0_0] : memref<128x8xf32, #tpu.memory_space<vmem>>, vector<128x8xf32>
    %1 = arith.truncf %0 : vector<128x8xf32> to vector<128x8xbf16>
    %c0_1 = arith.constant 0 : index
    %c0_2 = arith.constant 0 : index
    %2 = vector.load %arg2[%c0_1, %c0_2] : memref<8x128xbf16, #tpu.memory_space<vmem>>, vector<8x128xbf16>
    %cst = arith.constant dense<0.000000e+00> : vector<128x128xf32>
    %3 = tpu.matmul %1, %2, %cst {dimension_numbers = #tpu.dot_dimension_numbers<[1], [0], [0], [1], [0, 0, 1, 1], [], []>} : vector<128x8xbf16>, vector<8x128xbf16>, vector<128x128xf32> -> vector<128x128xf32>
    %c0_3 = arith.constant 0 : index
    %c0_4 = arith.constant 0 : index
    %4 = vector.load %arg3[%c0_3, %c0_4] : memref<1x128xf32, #tpu.memory_space<vmem>>, vector<1x128xf32>
    %5 = vector.broadcast %4 : vector<1x128xf32> to vector<128x128xf32>
    %6 = arith.addf %3, %5 : vector<128x128xf32>
    %cst_5 = arith.constant 0.000000e+00 : f32
    %7 = vector.broadcast %cst_5 : f32 to vector<128x128xf32>
    %8 = arith.subf %7, %6 : vector<128x128xf32>
    %9 = math.exp %8 : vector<128x128xf32>
    %cst_6 = arith.constant 1.000000e+00 : f32
    %10 = vector.broadcast %cst_6 : f32 to vector<128x128xf32>
    %11 = arith.addf %10, %9 : vector<128x128xf32>
    %12 = tpu.reciprocal %11 {approx = true} : vector<128x128xf32> -> vector<128x128xf32>
    %13 = arith.mulf %6, %12 : vector<128x128xf32>
    %14 = arith.truncf %13 : vector<128x128xf32> to vector<128x128xbf16>
    %c0_7 = arith.constant 0 : index
    %c0_8 = arith.constant 0 : index
    %c0_9 = arith.constant 0 : index
    %15 = vector.load %arg4[%c0_7, %c0_8, %c0_9] : memref<2x128x128xbf16, #tpu.memory_space<vmem>>, vector<1x128x128xbf16>
    %16 = vector.shape_cast %15 : vector<1x128x128xbf16> to vector<128x128xbf16>
    %cst_10 = arith.constant dense<0.000000e+00> : vector<128x128xf32>
    %17 = tpu.matmul %14, %16, %cst_10 {dimension_numbers = #tpu.dot_dimension_numbers<[1], [0], [0], [1], [0, 0, 1, 1], [], []>} : vector<128x128xbf16>, vector<128x128xbf16>, vector<128x128xf32> -> vector<128x128xf32>
    %c0_11 = arith.constant 0 : index
    %c0_12 = arith.constant 0 : index
    %c0_13 = arith.constant 0 : index
    %18 = vector.load %arg5[%c0_11, %c0_12, %c0_13] : memref<2x1x128xf32, #tpu.memory_space<vmem>>, vector<1x1x128xf32>
    %19 = vector.shape_cast %18 : vector<1x1x128xf32> to vector<1x128xf32>
    %20 = vector.broadcast %19 : vector<1x128xf32> to vector<128x128xf32>
    %21 = arith.addf %17, %20 : vector<128x128xf32>
    %cst_14 = arith.constant 0.000000e+00 : f32
    %22 = vector.broadcast %cst_14 : f32 to vector<128x128xf32>
    %23 = arith.subf %22, %21 : vector<128x128xf32>
    %24 = math.exp %23 : vector<128x128xf32>
    %cst_15 = arith.constant 1.000000e+00 : f32
    %25 = vector.broadcast %cst_15 : f32 to vector<128x128xf32>
    %26 = arith.addf %25, %24 : vector<128x128xf32>
    %27 = tpu.reciprocal %26 {approx = true} : vector<128x128xf32> -> vector<128x128xf32>
    %28 = arith.mulf %21, %27 : vector<128x128xf32>
    %29 = arith.truncf %28 : vector<128x128xf32> to vector<128x128xbf16>
    %c1 = arith.constant 1 : index
    %c0_16 = arith.constant 0 : index
    %c0_17 = arith.constant 0 : index
    %30 = vector.load %arg4[%c1, %c0_16, %c0_17] : memref<2x128x128xbf16, #tpu.memory_space<vmem>>, vector<1x128x128xbf16>
    %31 = vector.shape_cast %30 : vector<1x128x128xbf16> to vector<128x128xbf16>
    %cst_18 = arith.constant dense<0.000000e+00> : vector<128x128xf32>
    %32 = tpu.matmul %29, %31, %cst_18 {dimension_numbers = #tpu.dot_dimension_numbers<[1], [0], [0], [1], [0, 0, 1, 1], [], []>} : vector<128x128xbf16>, vector<128x128xbf16>, vector<128x128xf32> -> vector<128x128xf32>
    %c1_19 = arith.constant 1 : index
    %c0_20 = arith.constant 0 : index
    %c0_21 = arith.constant 0 : index
    %33 = vector.load %arg5[%c1_19, %c0_20, %c0_21] : memref<2x1x128xf32, #tpu.memory_space<vmem>>, vector<1x1x128xf32>
    %34 = vector.shape_cast %33 : vector<1x1x128xf32> to vector<1x128xf32>
    %35 = vector.broadcast %34 : vector<1x128xf32> to vector<128x128xf32>
    %36 = arith.addf %32, %35 : vector<128x128xf32>
    %cst_22 = arith.constant 0.000000e+00 : f32
    %37 = vector.broadcast %cst_22 : f32 to vector<128x128xf32>
    %38 = arith.subf %37, %36 : vector<128x128xf32>
    %39 = math.exp %38 : vector<128x128xf32>
    %cst_23 = arith.constant 1.000000e+00 : f32
    %40 = vector.broadcast %cst_23 : f32 to vector<128x128xf32>
    %41 = arith.addf %40, %39 : vector<128x128xf32>
    %42 = tpu.reciprocal %41 {approx = true} : vector<128x128xf32> -> vector<128x128xf32>
    %43 = arith.mulf %36, %42 : vector<128x128xf32>
    %44 = arith.truncf %43 : vector<128x128xf32> to vector<128x128xbf16>
    %c0_24 = arith.constant 0 : index
    %c0_25 = arith.constant 0 : index
    %45 = vector.load %arg6[%c0_24, %c0_25] : memref<128x128xbf16, #tpu.memory_space<vmem>>, vector<128x128xbf16>
    %cst_26 = arith.constant dense<0.000000e+00> : vector<128x128xf32>
    %46 = tpu.matmul %44, %45, %cst_26 {dimension_numbers = #tpu.dot_dimension_numbers<[1], [0], [0], [1], [0, 0, 1, 1], [], []>} : vector<128x128xbf16>, vector<128x128xbf16>, vector<128x128xf32> -> vector<128x128xf32>
    %c0_27 = arith.constant 0 : index
    %c0_28 = arith.constant 0 : index
    %47 = vector.load %arg7[%c0_27, %c0_28] : memref<1x128xf32, #tpu.memory_space<vmem>>, vector<1x128xf32>
    %48 = vector.broadcast %47 : vector<1x128xf32> to vector<128x128xf32>
    %49 = arith.addf %46, %48 : vector<128x128xf32>
    %c0_29 = arith.constant 0 : index
    %c0_30 = arith.constant 0 : index
    %50 = vector.load %arg8[%c0_29, %c0_30] : memref<128x128xf32, #tpu.memory_space<vmem>>, vector<128x128xf32>
    tpu.vector_store %arg8[%c0_29, %c0_30], %49 {strides = array<i32>} : memref<128x128xf32, #tpu.memory_space<vmem>>, vector<128x128xf32>,
    return
  }
  func.func @transform_0(%arg0: i32) -> (i32, i32) {
    %c0_i32 = arith.constant 0 : i32
    %c0_i32_0 = arith.constant 0 : i32
    return %arg0, %c0_i32 : i32, i32
  }
  func.func @transform_1(%arg0: i32) -> (i32, i32) {
    %c0_i32 = arith.constant 0 : i32
    %c0_i32_0 = arith.constant 0 : i32
    %c0_i32_1 = arith.constant 0 : i32
    return %c0_i32, %c0_i32_0 : i32, i32
  }
  func.func @transform_2(%arg0: i32) -> (i32, i32) {
    %c0_i32 = arith.constant 0 : i32
    %c0_i32_0 = arith.constant 0 : i32
    %c0_i32_1 = arith.constant 0 : i32
    return %c0_i32, %c0_i32_0 : i32, i32
  }
  func.func @transform_3(%arg0: i32) -> (i32, i32, i32) {
    %c0_i32 = arith.constant 0 : i32
    %c0_i32_0 = arith.constant 0 : i32
    %c0_i32_1 = arith.constant 0 : i32
    %c0_i32_2 = arith.constant 0 : i32
    return %c0_i32, %c0_i32_0, %c0_i32_1 : i32, i32, i32
  }
  func.func @transform_4(%arg0: i32) -> (i32, i32, i32) {
    %c0_i32 = arith.constant 0 : i32
    %c0_i32_0 = arith.constant 0 : i32
    %c0_i32_1 = arith.constant 0 : i32
    %c0_i32_2 = arith.constant 0 : i32
    return %c0_i32, %c0_i32_0, %c0_i32_1 : i32, i32, i32
  }
  func.func @transform_5(%arg0: i32) -> (i32, i32) {
    %c0_i32 = arith.constant 0 : i32
    %c0_i32_0 = arith.constant 0 : i32
    %c0_i32_1 = arith.constant 0 : i32
    return %c0_i32, %c0_i32_0 : i32, i32
  }
  func.func @transform_6(%arg0: i32) -> (i32, i32) {
    %c0_i32 = arith.constant 0 : i32
    %c0_i32_0 = arith.constant 0 : i32
    %c0_i32_1 = arith.constant 0 : i32
    return %c0_i32, %c0_i32_0 : i32, i32
  }
  func.func @transform_7(%arg0: i32) -> (i32, i32) {
    %c0_i32 = arith.constant 0 : i32
    %c0_i32_0 = arith.constant 0 : i32
    return %arg0, %c0_i32 : i32, i32
  }
}

</mosaic_0001>

<bundles_post_ra>
// kernel: tpu_custom_call.1
= control target key start
LH: loop header
LB: loop body
LE: loop exit
PB: predicated region body
PF: predicated region fallthrough
CT: control target
= control target key end

     0   :  { %12 = vsyncpa [#allocation3], 0  ;;  %s2448_s0 = inlined_call_operand.vmem [shape: f32[256,8], index: 0, kind: input, shape index: {}]   ;;  %s2449_s1 = inlined_call_operand.vmem [shape: bf16[8,128], index: 1, kind: input, shape index: {}]   ;;  %s2450_s2 = inlined_call_operand.vmem [shape: f32[1,128], index: 2, kind: input, shape index: {}]   ;;  %s2451_s3 = inlined_call_operand.vmem [shape: bf16[2,128,128], index: 3, kind: input, shape index: {}]   ;;  %s2452_s4 = inlined_call_operand.vmem [shape: f32[2,1,128], index: 4, kind: input, shape index: {}]   ;;  %s2453_s5 = inlined_call_operand.vmem [shape: bf16[128,128], index: 5, kind: input, shape index: {}]   ;;  %s2454_s6 = inlined_call_operand.vmem [shape: f32[1,128], index: 6, kind: input, shape index: {}]   ;;  %s2455_s7 = inlined_call_operand.hbm [shape: f32[256,128], index: 7, kind: output, shape index: {}]  }
   0x1   :  { %14 = vsyncpa [#allocation3 + $0x1], 0  ;;  %s1965_s24 = smov 0   ;;  %s1967_s25 = smov 0  }
   0x2   :  { %s1969_s26 = smov 0   ;;  %s1971_s27 = smov 0  }
   0x3 LB: > { %s1986_s28 = sadd.s32 4294967295, %s1920_s27   ;;  %s1349_s29 = sadd.s32 4294967294, %s1920_s27   ;;  %s1920_s27 = sphi %s1971_s27, %s2461_s27   ;;  %s1916_s26 = sphi %s1969_s26, %s2460_s26   ;;  %s1912_s25 = sphi %s1967_s25, %s2459_s25   ;;  %s1908_s24 = sphi %s1965_s24, %s2458_s24  }
   0x4   : > { %s1990_s30 = sadd.s32 1, %s1920_s27   ;;  %s179_s8 = sadd.s32 1, %s1916_s26 }
   0x5   : > { %s176_s9 = ssub.s32 %s1920_s27, %s1990_s30  ;;  %p189_p0 = scmp.ne.s32.totalorder %s1916_s26, %s1912_s25 }
   0x6   : > { %p177_p1 = scmp.eq.s32.totalorder %s176_s9, 0  ;;  %p190_p2 = scmp.eq.s32.totalorder %s1986_s28, 1 }
   0x7   : > { %p195_p3 = scmp.ne.s32.totalorder %s1912_s25, %s1908_s24  ;;  %p196_p4 = scmp.eq.s32.totalorder %s1349_s29, 1 }
   0x8   : > { %s2001_s10 = scalar_select %p177_p1, %s1916_s26, %s179_s8  }
   0x9   : > { %p2003_p5 = por %p190_p2, %p189_p0  ;;  %p2007_p6 = por %p196_p4, %p195_p3 }
   0xa   : > { %p1352_p7 = scmp.ge.s32.totalorder %s1920_s27, 1  ;;  %p241_p8 = scmp.lt.s32.totalorder %s1920_s27, 3 }
   0xc   : > { %p242_p9 = pnand %p1352_p7, %p241_p8 }
   0xd   : > { %s1354_s15 = sshll.u32 (!%p242_p9), %s1986_s28, 4  ;;  %s270_s18 = sand.u32 (!%p242_p9), 1, %s1912_s25  }
   0xe   : > { %245 = sbr.rel (%p242_p9) target bundleno = 986 (0x3da), region = 48  ;;  %p274_p10 = scmp.lt.s32.totalorder (!%p242_p9), %s1354_s15, 31 }
   0xf   : > { %s1414_s23 = sshll.u32 (!%p242_p9), %s1986_s28, 11  ;;  %s2408_s28 = scalar_lea.sflag (!%p242_p9), [#allocation3], %s270_s18 }
  0x10   : > { %s2400_s13 = scalar_lea.hbm (!%p242_p9), %s2455_s7, %s1414_s23 }
  0x13   : > { %v305_v0 = vld [vmem:[%s2449_s1] sm:$0xf]  ;;  %vm338_vm0 = vcmask 1043456   ;;  %s2463_s15 = smov (!%p274_p10, %s1354_s15), 31  ;;  %vm313_vm1 = vcmask 64512   ;;  %v1644_v26 = vld [vmem:[%s2451_s3 + $0x38] sm:$0xff]  }
  0x14   : > { %1602 = vmatprep.subr.msk.bf16.mxu0 %vm338_vm0, %v305_v0  ;;  %v340_v1 = vsel %vm338_vm0, %v305_v0, 0  ;;  %s1355_s16 = sshll.u32 %s2463_s15, 3  ;;  %1490 = vmatprep.subr.bf16.mxu1 %v1644_v26  ;;  %v1645_v27 = vld [vmem:[%s2451_s3 + $0x30] sm:$0xff]   ;;  %v1646_v28 = vld [vmem:[%s2451_s3 + $0x28] sm:$0xff]   ;;  %v1647_v29 = vld [vmem:[%s2451_s3 + $0x20] sm:$0xff]   ;;  %s1922_s15 = smov [#allocation2]  }
  0x15   : > { %1473 = vmatpush3.bf16.msra.mxu0 %v340_v1  ;;  %s2020_s19 = scalar_lea.vmem %s2448_s0, %s1355_s16  ;;  %1491 = vmatpush3.bf16.msra.mxu1 %v1644_v26  ;;  %v1648_v30 = vld [vmem:[%s2451_s3 + $0x18] sm:$0xff]   ;;  %v1649_v31 = vld [vmem:[%s2451_s3 + $0x10] sm:$0xff]   ;;  %v1650_v32 = vld [vmem:[%s2451_s3 + $0x8] sm:$0xff]   ;;  %s1864_s16 = sshll.u32 %s1922_s15, 4  ;;  %s1865_s16 = int_to_ptr.vmem [resolvable:$false] %s1864_s16 }
  0x16   : > { %v281_v2 = vld [vmem:[%s2020_s19] sm:$0xff]  ;;  %v282_v3 = vld [vmem:[%s2020_s19 + $0x8] sm:$0xff]  ;;  %v283_v4 = vld [vmem:[%s2020_s19 + $0x10] sm:$0xff]  ;;  %1492 = vmatprep.subr.bf16.mxu1 %v1645_v27  ;;  %s1866_s17 = scalar_lea.vmem %s1865_s16, 4096 }
  0x17   : > { %v297_v5 = vpack.c.bf16 %v282_v3, %v281_v2  ;;  %v284_v6 = vld [vmem:[%s2020_s19 + $0x18] sm:$0xff]  ;;  %v285_v7 = vld [vmem:[%s2020_s19 + $0x20] sm:$0xff]  ;;  %v286_v8 = vld [vmem:[%s2020_s19 + $0x28] sm:$0xff] }
  0x18   : > { %v298_v9 = vpack.c.bf16 %v284_v6, %v283_v4  ;;  %v299_v10 = vpack.c.bf16 %v286_v8, %v285_v7  ;;  %v287_v11 = vld [vmem:[%s2020_s19 + $0x30] sm:$0xff]  ;;  %v288_v12 = vld [vmem:[%s2020_s19 + $0x38] sm:$0xff]  ;;  %v289_v13 = vld [vmem:[%s2020_s19 + $0x40] sm:$0xff] }
  0x19   : > { %1474 = vmatprep.mubr.msk.bf16.mxu0 %vm313_vm1, %v297_v5  ;;  %v290_v14 = vld [vmem:[%s2020_s19 + $0x48] sm:$0xff]  ;;  %v300_v15 = vpack.c.bf16 %v288_v12, %v287_v11  ;;  %v291_v17 = vld [vmem:[%s2020_s19 + $0x50] sm:$0xff]  ;;  %v292_v18 = vld [vmem:[%s2020_s19 + $0x58] sm:$0xff]  ;;  %1493 = vmatpush3.bf16.msra.mxu1 %v1645_v27 }
  0x1a   : > { %1475 = vmatmul.mubr.msk.bf16.vlgmr.msra.gmra.mxu0 %vm313_vm1, %v298_v9  ;;  %v301_v16 = vpack.c.bf16 %v290_v14, %v289_v13  ;;  %v293_v19 = vld [vmem:[%s2020_s19 + $0x60] sm:$0xff]  ;;  %v294_v20 = vld [vmem:[%s2020_s19 + $0x68] sm:$0xff]  ;;  %v302_v21 = vpack.c.bf16 %v292_v18, %v291_v17  ;;  %v295_v23 = vld [vmem:[%s2020_s19 + $0x70] sm:$0xff]  ;;  %1494 = vmatprep.subr.bf16.mxu1 %v1646_v28 }
  0x1b   : > { %1478 = vmatprep.mubr.msk.bf16.mxu0 %vm313_vm1, %v299_v10  ;;  %v303_v22 = vpack.c.bf16 %v294_v20, %v293_v19  ;;  %v296_v24 = vld [vmem:[%s2020_s19 + $0x78] sm:$0xff]  ;;  %v1651_v33 = vld [vmem:[%s2451_s3] sm:$0xff]   ;;  %s1353_s19 = sshll.u32 %s270_s18, 7 }
  0x1c   : > { %v304_v25 = vpack.c.bf16 %v296_v24, %v295_v23  ;;  %v2073_v34 = vld [vmem:[%s2450_s2] ss:$0 sm:$0xff]  ;;  %s2379_s22 = scalar_lea.vmem [#allocation2], %s1353_s19 }
  0x1d   : > { %1495 = vmatpush3.bf16.msra.mxu1 %v1646_v28  ;;  %s1287_s29 = sshll.u32 %s2379_s22, 4  ;;  %s2402_s29 = int_to_ptr.vmem [resolvable:$true] %s1287_s29 }
  0x1e   : > { %1496 = vmatprep.subr.bf16.mxu1 %v1647_v29  ;;  %s1860_s14 = scalar_lea.vmem %s2402_s29, 2048  ;;  %p1867_p0 = scmp.lt.s32.totalorder %s2402_s29, %s1865_s16 }
  0x1f   : > { %p1861_p11 = scmp.ne.s32.totalorder %s2402_s29, %s1860_s14  ;;  %p1868_p1 = scmp.lt.s32.totalorder %s1866_s17, %s1860_s14 }
  0x21   : > { %1497 = vmatpush3.bf16.msra.mxu1 %v1647_v29  ;;  %p1862_p12 = pnand %p1861_p11, %p2003_p5  ;;  %p1869_p2 = por %p1868_p1, %p1867_p0 }
  0x22   : > { %1479 = vmatmul.mubr.msk.bf16.gmra.mxu0 %vm313_vm1, %v300_v15  ;;  %1498 = vmatprep.subr.bf16.mxu1 %v1648_v30 }
  0x23   : > { %1482 = vmatprep.mubr.msk.bf16.mxu0 %vm313_vm1, %v301_v16  ;;  %p1863_p13 = pneg %p1862_p12 }
  0x25   : > { %1499 = vmatpush3.bf16.msra.mxu1 %v1648_v30  ;;  %p1870_p3 = pnand %p1869_p2, %p1863_p13 }
  0x26   : > { %1500 = vmatprep.subr.bf16.mxu1 %v1649_v31 }
  0x29   : > { %1501 = vmatpush3.bf16.msra.mxu1 %v1649_v31 }
  0x2a   : > { %1483 = vmatmul.mubr.msk.bf16.gmra.mxu0 %vm313_vm1, %v302_v21  ;;  %1502 = vmatprep.subr.bf16.mxu1 %v1650_v32 }
  0x2b   : > { %1486 = vmatprep.mubr.msk.bf16.mxu0 %vm313_vm1, %v303_v22 }
  0x2d   : > { %1503 = vmatpush3.bf16.msra.mxu1 %v1650_v32 }
  0x2e   : > { %1504 = vmatprep.subr.bf16.mxu1 %v1651_v33 }
  0x31   : > { %1505 = vmatpush3.bf16.msra.mxu1 %v1651_v33 }
  0x32   : > { %1487 = vmatmul.mubr.msk.bf16.gmra.mxu0 %vm313_vm1, %v304_v25 }
  0xda   : > { %v1476_v35 = vpop.f32.mrf.mxu0 }
  0xdb   : > { %v2076_v36 = vadd.f32 %v1476_v35, %v2073_v34 }
  0xdc   : > { %v376_v37 = vpop.f32.mrf.mxu0 }
  0xdd   : > { %v441_v38 = vsub.f32 0.0, %v2076_v36  ;;  %v2080_v39 = vadd.f32 %v2073_v34, %v376_v37 }
  0xde   : > { %v1477_v40 = vpop.f32.mrf.mxu0 }
  0xdf   : > { %v459_v41 = vmul.f32 1.442695, %v441_v38  ;;  %v439_v42 = vsub.f32 0.0, %v2080_v39  ;;  %v2084_v43 = vadd.f32 %v1477_v40, %v2073_v34 }
  0xe0   : > { %v379_v44 = vpop.f32.mrf.mxu0 }
  0xe1   : > { %1668 = vpow2.f32 %v459_v41  ;;  %v455_v45 = vmul.f32 1.442695, %v439_v42  ;;  %v442_v46 = vsub.f32 0.0, %v2084_v43  ;;  %v2088_v47 = vadd.f32 %v2073_v34, %v379_v44 }
  0xe2   : > { %v1480_v48 = vpop.f32.mrf.mxu0 }
  0xe3   : > { %1670 = vpow2.f32 %v455_v45  ;;  %v461_v49 = vmul.f32 1.442695, %v442_v46  ;;  %v440_v50 = vsub.f32 0.0, %v2088_v47  ;;  %v2092_v51 = vadd.f32 %v1480_v48, %v2073_v34 }
  0xe4   : > { %v392_v52 = vpop.f32.mrf.mxu0 }
  0xe5   : > { %1672 = vpow2.f32 %v461_v49  ;;  %v457_v53 = vmul.f32 1.442695, %v440_v50  ;;  %v445_v54 = vsub.f32 0.0, %v2092_v51  ;;  %v2096_v55 = vadd.f32 %v2073_v34, %v392_v52 }
  0xe6   : > { %v1481_v56 = vpop.f32.mrf.mxu0 }
  0xe7   : > { %1674 = vpow2.f32 %v457_v53  ;;  %v467_v57 = vmul.f32 1.442695, %v445_v54  ;;  %v443_v58 = vsub.f32 0.0, %v2096_v55  ;;  %v2100_v59 = vadd.f32 %v1481_v56, %v2073_v34 }
  0xe8   : > { %v395_v60 = vpop.f32.mrf.mxu0 }
  0xe9   : > { %1676 = vpow2.f32 %v467_v57  ;;  %v463_v61 = vmul.f32 1.442695, %v443_v58  ;;  %v446_v62 = vsub.f32 0.0, %v2100_v59  ;;  %v2104_v63 = vadd.f32 %v2073_v34, %v395_v60 }
  0xea   : > { %v1484_v0 = vpop.f32.mrf.mxu0 }
  0xeb   : > { %1678 = vpow2.f32 %v463_v61  ;;  %v469_v1 = vmul.f32 1.442695, %v446_v62  ;;  %v444_v2 = vsub.f32 0.0, %v2104_v63  ;;  %v2108_v3 = vadd.f32 %v1484_v0, %v2073_v34 }
  0xec   : > { %v408_v4 = vpop.f32.mrf.mxu0 }
  0xed   : > { %1680 = vpow2.f32 %v469_v1  ;;  %v465_v5 = vmul.f32 1.442695, %v444_v2  ;;  %v449_v6 = vsub.f32 0.0, %v2108_v3  ;;  %v2112_v7 = vadd.f32 %v2073_v34, %v408_v4 }
  0xee   : > { %v1669_v8 = vpop.eup %1668  ;;  %v1485_v9 = vpop.f32.mrf.mxu0 }
  0xef   : > { %v489_v10 = vadd.f32 1.0, %v1669_v8  ;;  %1682 = vpow2.f32 %v465_v5  ;;  %v475_v11 = vmul.f32 1.442695, %v449_v6  ;;  %v447_v12 = vsub.f32 0.0, %v2112_v7 }
  0xf0   : > { %v1671_v13 = vpop.eup %1670  ;;  %v2116_v14 = vadd.f32 %v1485_v9, %v2073_v34  ;;  %v411_v15 = vpop.f32.mrf.mxu0 }
  0xf1   : > { %1684 = vrcp.f32 %v489_v10  ;;  %v487_v16 = vadd.f32 1.0, %v1671_v13  ;;  %v471_v17 = vmul.f32 1.442695, %v447_v12  ;;  %v2119_v18 = vadd.f32 %v2073_v34, %v411_v15 }
  0xf2   : > { %v1673_v19 = vpop.eup %1672  ;;  %1686 = vpow2.f32 %v475_v11  ;;  %v450_v20 = vsub.f32 0.0, %v2116_v14  ;;  %v1488_v21 = vpop.f32.mrf.mxu0 }
  0xf3   : > { %1688 = vrcp.f32 %v487_v16  ;;  %v490_v22 = vadd.f32 1.0, %v1673_v19  ;;  %v448_v23 = vsub.f32 0.0, %v2119_v18  ;;  %v2124_v24 = vadd.f32 %v1488_v21, %v2073_v34 }
  0xf4   : > { %v1675_v25 = vpop.eup %1674  ;;  %1690 = vpow2.f32 %v471_v17  ;;  %v477_v26 = vmul.f32 1.442695, %v450_v20  ;;  %v424_v27 = vpop.f32.mrf.mxu0 }
  0xf5   : > { %1692 = vrcp.f32 %v490_v22  ;;  %v488_v28 = vadd.f32 1.0, %v1675_v25  ;;  %v473_v29 = vmul.f32 1.442695, %v448_v23  ;;  %v453_v30 = vsub.f32 0.0, %v2124_v24 }
  0xf6   : > { %v1677_v31 = vpop.eup %1676  ;;  %1694 = vpow2.f32 %v477_v26  ;;  %v2128_v32 = vadd.f32 %v2073_v34, %v424_v27  ;;  %v1489_v33 = vpop.f32.mrf.mxu0 }
  0xf7   : > { %1696 = vrcp.f32 %v488_v28  ;;  %v493_v35 = vadd.f32 1.0, %v1677_v31  ;;  %v483_v37 = vmul.f32 1.442695, %v453_v30  ;;  %v2131_v38 = vadd.f32 %v1489_v33, %v2073_v34 }
  0xf8   : > { %v1679_v40 = vpop.eup %1678  ;;  %1698 = vpow2.f32 %v473_v29  ;;  %v451_v41 = vsub.f32 0.0, %v2128_v32  ;;  %v427_v42 = vpop.f32.mrf.mxu0 }
  0xf9   : > { %1700 = vrcp.f32 %v493_v35  ;;  %v491_v44 = vadd.f32 1.0, %v1679_v40  ;;  %v454_v45 = vsub.f32 0.0, %v2131_v38  ;;  %v2136_v46 = vadd.f32 %v2073_v34, %v427_v42 }
  0xfa   : > { %v1681_v48 = vpop.eup %1680  ;;  %1702 = vpow2.f32 %v483_v37  ;;  %v479_v49 = vmul.f32 1.442695, %v451_v41 }
  0xfb   : > { %1704 = vrcp.f32 %v491_v44  ;;  %v494_v50 = vadd.f32 1.0, %v1681_v48  ;;  %v485_v52 = vmul.f32 1.442695, %v454_v45  ;;  %v452_v53 = vsub.f32 0.0, %v2136_v46 }
  0xfc   : > { %v1683_v54 = vpop.eup %1682  ;;  %1706 = vpow2.f32 %v479_v49 }
  0xfd   : > { %1708 = vrcp.f32 %v494_v50  ;;  %v492_v56 = vadd.f32 1.0, %v1683_v54  ;;  %v481_v57 = vmul.f32 1.442695, %v452_v53  ;;  %v1657_v54 = vld [vmem:[%s2451_s3 + $0x50] sm:$0xff]  }
  0xfe   : > { %v1685_v58 = vpop.eup %1684  ;;  %1710 = vpow2.f32 %v485_v52 }
  0xff   : > { %v1687_v60 = vpop.eup %1686  ;;  %1712 = vrcp.f32 %v492_v56  ;;  %v521_v12 = vmul.f32 %v1685_v58, %v2076_v36  ;;  %v1658_v56 = vld [vmem:[%s2451_s3 + $0x48] sm:$0xff]   ;;  %v2182_v58 = vld [vmem:[%s2452_s4] ss:$0 sm:$0xff] }
 0x100   : > { %v1689_v61 = vpop.eup %1688  ;;  %1714 = vpow2.f32 %v481_v57  ;;  %v497_v2 = vadd.f32 1.0, %v1687_v60  ;;  %v1659_v57 = vld [vmem:[%s2451_s3 + $0x40] sm:$0xff]  }
 0x101   : > { %v1691_v34 = vpop.eup %1690  ;;  %v519_v9 = vmul.f32 %v1689_v61, %v2080_v39 }
 0x102   : > { %v1693_v62 = vpop.eup %1692  ;;  %v495_v0 = vadd.f32 1.0, %v1691_v34 }
 0x103   : > { %v1695_v1 = vpop.eup %1694  ;;  %v522_v5 = vmul.f32 %v1693_v62, %v2084_v43 }
 0x104   : > { %v1697_v4 = vpop.eup %1696  ;;  %v498_v6 = vadd.f32 1.0, %v1695_v1  ;;  %1716 = vrcp.f32 %v495_v0 }
 0x105   : > { %v1699_v8 = vpop.eup %1698  ;;  %v520_v10 = vmul.f32 %v1697_v4, %v2088_v47  ;;  %v536_v19 = vpack.c.bf16 %v522_v5, %v521_v12 }
 0x106   : > { %v1701_v11 = vpop.eup %1700  ;;  %1718 = vrcp.f32 %v498_v6  ;;  %v496_v13 = vadd.f32 1.0, %v1699_v8 }
 0x107   : > { %v1703_v15 = vpop.eup %1702  ;;  %1720 = vrcp.f32 %v497_v2  ;;  %v535_v16 = vpack.c.bf16 %v520_v10, %v519_v9  ;;  %v525_v28 = vmul.f32 %v1701_v11, %v2092_v51 }
 0x108   : > { %v1705_v17 = vpop.eup %1704  ;;  %1722 = vrcp.f32 %v496_v13  ;;  %v501_v39 = vadd.f32 1.0, %v1703_v15 }
 0x109   : > { %v1707_v20 = vpop.eup %1706  ;;  %1506 = vmatprep.mubr.bf16.mxu1 %v535_v16  ;;  %v523_v26 = vmul.f32 %v1705_v17, %v2096_v55 }
 0x10a   : > { %v1709_v43 = vpop.eup %1708  ;;  %v499_v21 = vadd.f32 1.0, %v1707_v20  ;;  %1507 = vmatmul.mubr.bf16.vlgmr.msra.gmra.mxu1 %v536_v19 }
 0x10b   : > { %v1711_v22 = vpop.eup %1710  ;;  %v526_v47 = vmul.f32 %v1709_v43, %v2100_v59 }
 0x10c   : > { %v1713_v23 = vpop.eup %1712  ;;  %v502_v25 = vadd.f32 1.0, %v1711_v22  ;;  %1724 = vrcp.f32 %v499_v21 }
 0x10d   : > { %v1715_v36 = vpop.eup %1714  ;;  %v524_v27 = vmul.f32 %v1713_v23, %v2104_v63  ;;  %v538_v31 = vpack.c.bf16 %v526_v47, %v525_v28 }
 0x10e   : > { %1726 = vrcp.f32 %v502_v25  ;;  %v500_v29 = vadd.f32 1.0, %v1715_v36 }
 0x10f   : > { %1728 = vrcp.f32 %v501_v39  ;;  %v537_v30 = vpack.c.bf16 %v524_v27, %v523_v26 }
 0x110   : > { %1730 = vrcp.f32 %v500_v29 }
 0x111   : > { %1510 = vmatprep.mubr.bf16.mxu1 %v537_v30  ;;  %v1717_v33 = vpop.eup %1716 }
 0x112   : > { %1511 = vmatmul.mubr.bf16.gmra.mxu1 %v538_v31  ;;  %v527_v55 = vmul.f32 %v1717_v33, %v2112_v7 }
 0x113   : > { %v1719_v35 = vpop.eup %1718 }
 0x114   : > { %v1721_v59 = vpop.eup %1720  ;;  %v530_v40 = vmul.f32 %v1719_v35, %v2116_v14 }
 0x115   : > { %v1723_v37 = vpop.eup %1722  ;;  %v529_v51 = vmul.f32 %v1721_v59, %v2108_v3  ;;  %v1652_v3 = vld [vmem:[%s2451_s3 + $0x78] sm:$0xff]  }
 0x116   : > { %v528_v63 = vmul.f32 %v1723_v37, %v2119_v18  ;;  %1522 = vmatprep.subr.bf16.mxu0 %v1652_v3 }
 0x117   : > { %v540_v42 = vpack.c.bf16 %v530_v40, %v529_v51  ;;  %1523 = vmatpush3.bf16.msra.mxu0 %v1652_v3 }
 0x118   : > { %v539_v41 = vpack.c.bf16 %v528_v63, %v527_v55 }
 0x119   : > { %v1725_v44 = vpop.eup %1724 }
 0x11a   : > { %1514 = vmatprep.mubr.bf16.mxu1 %v539_v41  ;;  %v531_v52 = vmul.f32 %v1725_v44, %v2128_v32  ;;  %v1655_v32 = vld [vmem:[%s2451_s3 + $0x60] sm:$0xff]  }
 0x11b   : > { %v1727_v45 = vpop.eup %1726  ;;  %1515 = vmatmul.mubr.bf16.gmra.mxu1 %v540_v42 }
 0x11c   : > { %v1729_v48 = vpop.eup %1728  ;;  %v534_v50 = vmul.f32 %v1727_v45, %v2131_v38  ;;  %v1653_v38 = vld [vmem:[%s2451_s3 + $0x70] sm:$0xff]  }
 0x11d   : > { %v1731_v49 = vpop.eup %1730  ;;  %v533_v7 = vmul.f32 %v1729_v48, %v2124_v24  ;;  %1524 = vmatprep.subr.bf16.mxu0 %v1653_v38  ;;  %v1654_v24 = vld [vmem:[%s2451_s3 + $0x68] sm:$0xff]  }
 0x11e   : > { %v532_v14 = vmul.f32 %v1731_v49, %v2136_v46  ;;  %1525 = vmatpush3.bf16.msra.mxu0 %v1653_v38  ;;  %v1656_v46 = vld [vmem:[%s2451_s3 + $0x58] sm:$0xff]  }
 0x11f   : > { %v542_v18 = vpack.c.bf16 %v534_v50, %v533_v7  ;;  %1526 = vmatprep.subr.bf16.mxu0 %v1654_v24 }
 0x120   : > { %v541_v53 = vpack.c.bf16 %v532_v14, %v531_v52 }
 0x122   : > { %1518 = vmatprep.mubr.bf16.mxu1 %v541_v53  ;;  %1527 = vmatpush3.bf16.msra.mxu0 %v1654_v24 }
 0x123   : > { %1519 = vmatmul.mubr.bf16.gmra.mxu1 %v542_v18  ;;  %1528 = vmatprep.subr.bf16.mxu0 %v1655_v32 }
 0x126   : > { %1529 = vmatpush3.bf16.msra.mxu0 %v1655_v32 }
 0x127   : > { %1530 = vmatprep.subr.bf16.mxu0 %v1656_v46 }
 0x12a   : > { %1531 = vmatpush3.bf16.msra.mxu0 %v1656_v46 }
 0x12b   : > { %1532 = vmatprep.subr.bf16.mxu0 %v1657_v54 }
 0x12e   : > { %1533 = vmatpush3.bf16.msra.mxu0 %v1657_v54 }
 0x12f   : > { %1534 = vmatprep.subr.bf16.mxu0 %v1658_v56 }
 0x132   : > { %1535 = vmatpush3.bf16.msra.mxu0 %v1658_v56 }
 0x133   : > { %1536 = vmatprep.subr.bf16.mxu0 %v1659_v57 }
 0x136   : > { %1537 = vmatpush3.bf16.msra.mxu0 %v1659_v57 }
 0x1ca   : > { %v1508_v60 = vpop.f32.mrf.mxu1 }
 0x1cb   : > { %v2185_v61 = vadd.f32 %v1508_v60, %v2182_v58 }
 0x1cc   : > { %v648_v34 = vpop.f32.mrf.mxu1 }
 0x1cd   : > { %v713_v62 = vsub.f32 0.0, %v2185_v61  ;;  %v2189_v0 = vadd.f32 %v2182_v58, %v648_v34 }
 0x1ce   : > { %v1509_v1 = vpop.f32.mrf.mxu1 }
 0x1cf   : > { %v731_v2 = vmul.f32 1.442695, %v713_v62  ;;  %v711_v4 = vsub.f32 0.0, %v2189_v0  ;;  %v2193_v5 = vadd.f32 %v1509_v1, %v2182_v58 }
 0x1d0   : > { %v651_v6 = vpop.f32.mrf.mxu1 }
 0x1d1   : > { %1732 = vpow2.f32 %v731_v2  ;;  %v727_v8 = vmul.f32 1.442695, %v711_v4  ;;  %v714_v9 = vsub.f32 0.0, %v2193_v5  ;;  %v2197_v10 = vadd.f32 %v2182_v58, %v651_v6 }
 0x1d2   : > { %v1512_v11 = vpop.f32.mrf.mxu1 }
 0x1d3   : > { %1734 = vpow2.f32 %v727_v8  ;;  %v733_v12 = vmul.f32 1.442695, %v714_v9  ;;  %v712_v13 = vsub.f32 0.0, %v2197_v10  ;;  %v2201_v15 = vadd.f32 %v1512_v11, %v2182_v58 }
 0x1d4   : > { %v664_v16 = vpop.f32.mrf.mxu1 }
 0x1d5   : > { %1736 = vpow2.f32 %v733_v12  ;;  %v729_v17 = vmul.f32 1.442695, %v712_v13  ;;  %v717_v19 = vsub.f32 0.0, %v2201_v15  ;;  %v2205_v20 = vadd.f32 %v2182_v58, %v664_v16 }
 0x1d6   : > { %v1513_v43 = vpop.f32.mrf.mxu1 }
 0x1d7   : > { %1738 = vpow2.f32 %v729_v17  ;;  %v739_v21 = vmul.f32 1.442695, %v717_v19  ;;  %v715_v22 = vsub.f32 0.0, %v2205_v20  ;;  %v2209_v39 = vadd.f32 %v1513_v43, %v2182_v58 }
 0x1d8   : > { %v667_v23 = vpop.f32.mrf.mxu1 }
 0x1d9   : > { %1740 = vpow2.f32 %v739_v21  ;;  %v735_v47 = vmul.f32 1.442695, %v715_v22  ;;  %v718_v25 = vsub.f32 0.0, %v2209_v39  ;;  %v2213_v36 = vadd.f32 %v2182_v58, %v667_v23 }
 0x1db   : > { %1742 = vpow2.f32 %v735_v47  ;;  %v741_v26 = vmul.f32 1.442695, %v718_v25  ;;  %v716_v27 = vsub.f32 0.0, %v2213_v36  ;;  %v1516_v28 = vpop.f32.mrf.mxu1 }
 0x1dc   : > { %v2217_v29 = vadd.f32 %v1516_v28, %v2182_v58 }
 0x1dd   : > { %1744 = vpow2.f32 %v741_v26  ;;  %v737_v30 = vmul.f32 1.442695, %v716_v27  ;;  %v680_v31 = vpop.f32.mrf.mxu1 }
 0x1de   : > { %v1733_v33 = vpop.eup %1732  ;;  %v721_v35 = vsub.f32 0.0, %v2217_v29  ;;  %v2221_v59 = vadd.f32 %v2182_v58, %v680_v31 }
 0x1df   : > { %v761_v37 = vadd.f32 1.0, %v1733_v33  ;;  %1746 = vpow2.f32 %v737_v30  ;;  %v1517_v40 = vpop.f32.mrf.mxu1 }
 0x1e0   : > { %v1735_v55 = vpop.eup %1734  ;;  %v747_v63 = vmul.f32 1.442695, %v721_v35  ;;  %v719_v51 = vsub.f32 0.0, %v2221_v59  ;;  %v2225_v41 = vadd.f32 %v1517_v40, %v2182_v58 }
 0x1e1   : > { %1748 = vrcp.f32 %v761_v37  ;;  %v759_v42 = vadd.f32 1.0, %v1735_v55  ;;  %v683_v44 = vpop.f32.mrf.mxu1 }
 0x1e2   : > { %v1737_v45 = vpop.eup %1736  ;;  %1750 = vpow2.f32 %v747_v63  ;;  %v743_v48 = vmul.f32 1.442695, %v719_v51  ;;  %v722_v49 = vsub.f32 0.0, %v2225_v41  ;;  %v2229_v50 = vadd.f32 %v2182_v58, %v683_v44 }
 0x1e3   : > { %1752 = vrcp.f32 %v759_v42  ;;  %v762_v52 = vadd.f32 1.0, %v1737_v45  ;;  %v1520_v14 = vpop.f32.mrf.mxu1 }
 0x1e4   : > { %v1739_v7 = vpop.eup %1738  ;;  %1754 = vpow2.f32 %v743_v48  ;;  %v749_v53 = vmul.f32 1.442695, %v722_v49  ;;  %v720_v18 = vsub.f32 0.0, %v2229_v50  ;;  %v2233_v3 = vadd.f32 %v1520_v14, %v2182_v58 }
 0x1e5   : > { %1756 = vrcp.f32 %v762_v52  ;;  %v760_v38 = vadd.f32 1.0, %v1739_v7  ;;  %v696_v24 = vpop.f32.mrf.mxu1 }
 0x1e6   : > { %v1741_v32 = vpop.eup %1740  ;;  %1758 = vpow2.f32 %v749_v53  ;;  %v745_v46 = vmul.f32 1.442695, %v720_v18  ;;  %v725_v54 = vsub.f32 0.0, %v2233_v3  ;;  %v2237_v56 = vadd.f32 %v2182_v58, %v696_v24 }
 0x1e7   : > { %1760 = vrcp.f32 %v760_v38  ;;  %v765_v57 = vadd.f32 1.0, %v1741_v32  ;;  %v1521_v60 = vpop.f32.mrf.mxu1 }
 0x1e8   : > { %v1743_v34 = vpop.eup %1742  ;;  %1762 = vpow2.f32 %v745_v46  ;;  %v755_v62 = vmul.f32 1.442695, %v725_v54  ;;  %v723_v1 = vsub.f32 0.0, %v2237_v56  ;;  %v2241_v2 = vadd.f32 %v1521_v60, %v2182_v58 }
 0x1e9   : > { %1764 = vrcp.f32 %v765_v57  ;;  %v763_v4 = vadd.f32 1.0, %v1743_v34  ;;  %v699_v6 = vpop.f32.mrf.mxu1 }
 0x1ea   : > { %v1745_v8 = vpop.eup %1744  ;;  %1766 = vpow2.f32 %v755_v62  ;;  %v751_v9 = vmul.f32 1.442695, %v723_v1  ;;  %v726_v11 = vsub.f32 0.0, %v2241_v2  ;;  %v2245_v12 = vadd.f32 %v2182_v58, %v699_v6 }
 0x1eb   : > { %1768 = vrcp.f32 %v763_v4  ;;  %v766_v13 = vadd.f32 1.0, %v1745_v8 }
 0x1ec   : > { %v1747_v16 = vpop.eup %1746  ;;  %1770 = vpow2.f32 %v751_v9  ;;  %v757_v17 = vmul.f32 1.442695, %v726_v11  ;;  %v724_v19 = vsub.f32 0.0, %v2245_v12 }
 0x1ed   : > { %1772 = vrcp.f32 %v766_v13  ;;  %v764_v43 = vadd.f32 1.0, %v1747_v16 }
 0x1ee   : > { %v1749_v21 = vpop.eup %1748  ;;  %1774 = vpow2.f32 %v757_v17  ;;  %v753_v22 = vmul.f32 1.442695, %v724_v19  ;;  %v1665_v19 = vld [vmem:[%s2453_s5 + $0x10] sm:$0xff]  }
 0x1ef   : > { %v1751_v23 = vpop.eup %1750  ;;  %1776 = vrcp.f32 %v764_v43  ;;  %v793_v63 = vmul.f32 %v1749_v21, %v2185_v61  ;;  %v1666_v43 = vld [vmem:[%s2453_s5 + $0x8] sm:$0xff]   ;;  %v1667_v21 = vld [vmem:[%s2453_s5] sm:$0xff]  }
 0x1f0   : > { %v1753_v47 = vpop.eup %1752  ;;  %1778 = vpow2.f32 %v753_v22  ;;  %v769_v28 = vadd.f32 1.0, %v1751_v23  ;;  %v2291_v22 = vld [vmem:[%s2452_s4 + $0x1] ss:$0 sm:$0xff] }
 0x1f1   : > { %v1755_v25 = vpop.eup %1754  ;;  %v791_v37 = vmul.f32 %v1753_v47, %v2189_v0 }
 0x1f2   : > { %v1757_v26 = vpop.eup %1756  ;;  %v767_v58 = vadd.f32 1.0, %v1755_v25 }
 0x1f3   : > { %v1759_v27 = vpop.eup %1758  ;;  %v794_v31 = vmul.f32 %v1757_v26, %v2193_v5 }
 0x1f4   : > { %v1761_v30 = vpop.eup %1760  ;;  %v770_v33 = vadd.f32 1.0, %v1759_v27  ;;  %1780 = vrcp.f32 %v767_v58 }
 0x1f5   : > { %v1763_v35 = vpop.eup %1762  ;;  %v792_v40 = vmul.f32 %v1761_v30, %v2197_v10  ;;  %v808_v48 = vpack.c.bf16 %v794_v31, %v793_v63 }
 0x1f6   : > { %v1765_v55 = vpop.eup %1764  ;;  %1782 = vrcp.f32 %v770_v33  ;;  %v768_v51 = vadd.f32 1.0, %v1763_v35 }
 0x1f7   : > { %v1767_v42 = vpop.eup %1766  ;;  %1784 = vrcp.f32 %v769_v28  ;;  %v807_v44 = vpack.c.bf16 %v792_v40, %v791_v37  ;;  %v797_v24 = vmul.f32 %v1765_v55, %v2201_v15 }
 0x1f8   : > { %v1769_v45 = vpop.eup %1768  ;;  %1786 = vrcp.f32 %v768_v51  ;;  %v773_v14 = vadd.f32 1.0, %v1767_v42 }
 0x1f9   : > { %v1771_v49 = vpop.eup %1770  ;;  %1538 = vmatprep.mubr.bf16.mxu0 %v807_v44  ;;  %v795_v18 = vmul.f32 %v1769_v45, %v2205_v20 }
 0x1fa   : > { %v1773_v5 = vpop.eup %1772  ;;  %v771_v52 = vadd.f32 1.0, %v1771_v49  ;;  %1539 = vmatmul.mubr.bf16.vlgmr.msra.gmra.mxu0 %v808_v48 }
 0x1fb   : > { %v1775_v0 = vpop.eup %1774  ;;  %v798_v7 = vmul.f32 %v1773_v5, %v2209_v39 }
 0x1fc   : > { %v1777_v10 = vpop.eup %1776  ;;  %v774_v53 = vadd.f32 1.0, %v1775_v0  ;;  %1788 = vrcp.f32 %v771_v52 }
 0x1fd   : > { %v1779_v61 = vpop.eup %1778  ;;  %v796_v38 = vmul.f32 %v1777_v10, %v2213_v36  ;;  %v810_v54 = vpack.c.bf16 %v798_v7, %v797_v24 }
 0x1fe   : > { %1790 = vrcp.f32 %v774_v53  ;;  %v772_v32 = vadd.f32 1.0, %v1779_v61 }
 0x1ff   : > { %1792 = vrcp.f32 %v773_v14  ;;  %v809_v46 = vpack.c.bf16 %v796_v38, %v795_v18 }
 0x200   : > { %1794 = vrcp.f32 %v772_v32 }
 0x201   : > { %1542 = vmatprep.mubr.bf16.mxu0 %v809_v46  ;;  %v1781_v57 = vpop.eup %1780 }
 0x202   : > { %1543 = vmatmul.mubr.bf16.gmra.mxu0 %v810_v54  ;;  %v799_v20 = vmul.f32 %v1781_v57, %v2221_v59 }
 0x203   : > { %v1783_v60 = vpop.eup %1782 }
 0x204   : > { %v1785_v39 = vpop.eup %1784  ;;  %v802_v62 = vmul.f32 %v1783_v60, %v2225_v41 }
 0x205   : > { %v1787_v34 = vpop.eup %1786  ;;  %v801_v15 = vmul.f32 %v1785_v39, %v2217_v29  ;;  %v1660_v29 = vld [vmem:[%s2453_s5 + $0x38] sm:$0xff]  }
 0x206   : > { %v800_v36 = vmul.f32 %v1787_v34, %v2229_v50  ;;  %1554 = vmatprep.subr.bf16.mxu0 %v1660_v29  ;;  %1586 = vmatprep.subr.bf16.mxu1 %v1660_v29 }
 0x207   : > { %v812_v4 = vpack.c.bf16 %v802_v62, %v801_v15  ;;  %1555 = vmatpush3.bf16.msra.mxu0 %v1660_v29  ;;  %1594 = vmatpush3.bf16.msra.mxu1 %v1660_v29 }
 0x208   : > { %v811_v1 = vpack.c.bf16 %v800_v36, %v799_v20 }
 0x209   : > { %v1789_v6 = vpop.eup %1788 }
 0x20a   : > { %1546 = vmatprep.mubr.bf16.mxu0 %v811_v1  ;;  %v803_v16 = vmul.f32 %v1789_v6, %v2237_v56  ;;  %v1661_v56 = vld [vmem:[%s2453_s5 + $0x30] sm:$0xff]  }
 0x20b   : > { %v1791_v8 = vpop.eup %1790  ;;  %1547 = vmatmul.mubr.bf16.gmra.mxu0 %v812_v4  ;;  %1556 = vmatprep.subr.bf16.mxu0 %v1661_v56 }
 0x20c   : > { %v1793_v9 = vpop.eup %1792  ;;  %v806_v13 = vmul.f32 %v1791_v8, %v2241_v2  ;;  %1587 = vmatprep.subr.bf16.mxu1 %v1661_v56  ;;  %1557 = vmatpush3.bf16.msra.mxu0 %v1661_v56  ;;  %v1663_v2 = vld [vmem:[%s2453_s5 + $0x20] sm:$0xff]  }
 0x20d   : > { %v1795_v11 = vpop.eup %1794  ;;  %v805_v59 = vmul.f32 %v1793_v9, %v2233_v3  ;;  %1595 = vmatpush3.bf16.msra.mxu1 %v1661_v56  ;;  %v1662_v3 = vld [vmem:[%s2453_s5 + $0x28] sm:$0xff]  }
 0x20e   : > { %v804_v41 = vmul.f32 %v1795_v11, %v2245_v12  ;;  %1558 = vmatprep.subr.bf16.mxu0 %v1662_v3  ;;  %1588 = vmatprep.subr.bf16.mxu1 %v1662_v3  ;;  %v1664_v12 = vld [vmem:[%s2453_s5 + $0x18] sm:$0xff]  }
 0x20f   : > { %v814_v50 = vpack.c.bf16 %v806_v13, %v805_v59 }
 0x210   : > { %v813_v17 = vpack.c.bf16 %v804_v41, %v803_v16  ;;  %1559 = vmatpush3.bf16.msra.mxu0 %v1662_v3 }
 0x211   : > { %1596 = vmatpush3.bf16.msra.mxu1 %v1662_v3  ;;  %1560 = vmatprep.subr.bf16.mxu0 %v1663_v2 }
 0x212   : > { %1550 = vmatprep.mubr.bf16.mxu0 %v813_v17  ;;  %1589 = vmatprep.subr.bf16.mxu1 %v1663_v2 }
 0x213   : > { %1551 = vmatmul.mubr.bf16.gmra.mxu0 %v814_v50 }
 0x214   : > { %1561 = vmatpush3.bf16.msra.mxu0 %v1663_v2 }
 0x215   : > { %1597 = vmatpush3.bf16.msra.mxu1 %v1663_v2  ;;  %1562 = vmatprep.subr.bf16.mxu0 %v1664_v12 }
 0x216   : > { %1590 = vmatprep.subr.bf16.mxu1 %v1664_v12 }
 0x218   : > { %1563 = vmatpush3.bf16.msra.mxu0 %v1664_v12 }
 0x219   : > { %1598 = vmatpush3.bf16.msra.mxu1 %v1664_v12  ;;  %1564 = vmatprep.subr.bf16.mxu0 %v1665_v19 }
 0x21a   : > { %1591 = vmatprep.subr.bf16.mxu1 %v1665_v19 }
 0x21c   : > { %1565 = vmatpush3.bf16.msra.mxu0 %v1665_v19 }
 0x21d   : > { %1599 = vmatpush3.bf16.msra.mxu1 %v1665_v19  ;;  %1566 = vmatprep.subr.bf16.mxu0 %v1666_v43 }
 0x21e   : > { %1592 = vmatprep.subr.bf16.mxu1 %v1666_v43 }
 0x220   : > { %1567 = vmatpush3.bf16.msra.mxu0 %v1666_v43 }
 0x221   : > { %1600 = vmatpush3.bf16.msra.mxu1 %v1666_v43  ;;  %1568 = vmatprep.subr.bf16.mxu0 %v1667_v21 }
 0x222   : > { %1593 = vmatprep.subr.bf16.mxu1 %v1667_v21 }
 0x224   : > { %1569 = vmatpush3.bf16.msra.mxu0 %v1667_v21 }
 0x225   : > { %1601 = vmatpush3.bf16.msra.mxu1 %v1667_v21 }
 0x2ba   : > { %v1540_v23 = vpop.f32.mrf.mxu0 }
 0x2bb   : > { %v2294_v47 = vadd.f32 %v1540_v23, %v2291_v22 }
 0x2bc   : > { %v922_v25 = vpop.f32.mrf.mxu0 }
 0x2bd   : > { %v987_v26 = vsub.f32 0.0, %v2294_v47  ;;  %v2298_v58 = vadd.f32 %v2291_v22, %v922_v25 }
 0x2be   : > { %v1541_v27 = vpop.f32.mrf.mxu0 }
 0x2bf   : > { %v1005_v28 = vmul.f32 1.442695, %v987_v26  ;;  %v985_v30 = vsub.f32 0.0, %v2298_v58  ;;  %v2302_v31 = vadd.f32 %v1541_v27, %v2291_v22 }
 0x2c0   : > { %v925_v33 = vpop.f32.mrf.mxu0 }
 0x2c1   : > { %1796 = vpow2.f32 %v1005_v28  ;;  %v1001_v35 = vmul.f32 1.442695, %v985_v30  ;;  %v988_v37 = vsub.f32 0.0, %v2302_v31  ;;  %v2306_v40 = vadd.f32 %v2291_v22, %v925_v33 }
 0x2c2   : > { %v1544_v55 = vpop.f32.mrf.mxu0 }
 0x2c3   : > { %1798 = vpow2.f32 %v1001_v35  ;;  %v1007_v63 = vmul.f32 1.442695, %v988_v37  ;;  %v986_v51 = vsub.f32 0.0, %v2306_v40  ;;  %v2310_v42 = vadd.f32 %v1544_v55, %v2291_v22 }
 0x2c4   : > { %v938_v44 = vpop.f32.mrf.mxu0 }
 0x2c5   : > { %1800 = vpow2.f32 %v1007_v63  ;;  %v1003_v45 = vmul.f32 1.442695, %v986_v51  ;;  %v991_v48 = vsub.f32 0.0, %v2310_v42  ;;  %v2314_v49 = vadd.f32 %v2291_v22, %v938_v44 }
 0x2c6   : > { %v1545_v5 = vpop.f32.mrf.mxu0 }
 0x2c7   : > { %1802 = vpow2.f32 %v1003_v45  ;;  %v1013_v52 = vmul.f32 1.442695, %v991_v48  ;;  %v989_v0 = vsub.f32 0.0, %v2314_v49  ;;  %v2318_v14 = vadd.f32 %v1545_v5, %v2291_v22 }
 0x2c8   : > { %v941_v10 = vpop.f32.mrf.mxu0 }
 0x2c9   : > { %1804 = vpow2.f32 %v1013_v52  ;;  %v1009_v7 = vmul.f32 1.442695, %v989_v0  ;;  %v992_v53 = vsub.f32 0.0, %v2318_v14  ;;  %v2322_v61 = vadd.f32 %v2291_v22, %v941_v10 }
 0x2cb   : > { %1806 = vpow2.f32 %v1009_v7  ;;  %v1015_v18 = vmul.f32 1.442695, %v992_v53  ;;  %v990_v38 = vsub.f32 0.0, %v2322_v61  ;;  %v1548_v24 = vpop.f32.mrf.mxu0 }
 0x2cc   : > { %v2326_v32 = vadd.f32 %v1548_v24, %v2291_v22 }
 0x2cd   : > { %1808 = vpow2.f32 %v1015_v18  ;;  %v1011_v46 = vmul.f32 1.442695, %v990_v38  ;;  %v954_v54 = vpop.f32.mrf.mxu0 }
 0x2ce   : > { %v1797_v57 = vpop.eup %1796  ;;  %v995_v60 = vsub.f32 0.0, %v2326_v32  ;;  %v2330_v39 = vadd.f32 %v2291_v22, %v954_v54 }
 0x2cf   : > { %v1035_v34 = vadd.f32 1.0, %v1797_v57  ;;  %1810 = vpow2.f32 %v1011_v46  ;;  %v1549_v62 = vpop.f32.mrf.mxu0 }
 0x2d0   : > { %v1799_v20 = vpop.eup %1798  ;;  %v1021_v36 = vmul.f32 1.442695, %v995_v60  ;;  %v993_v15 = vsub.f32 0.0, %v2330_v39  ;;  %v2334_v1 = vadd.f32 %v1549_v62, %v2291_v22 }
 0x2d1   : > { %1812 = vrcp.f32 %v1035_v34  ;;  %v1033_v4 = vadd.f32 1.0, %v1799_v20  ;;  %v957_v6 = vpop.f32.mrf.mxu0 }
 0x2d2   : > { %v1801_v8 = vpop.eup %1800  ;;  %1814 = vpow2.f32 %v1021_v36  ;;  %v1017_v9 = vmul.f32 1.442695, %v993_v15  ;;  %v996_v11 = vsub.f32 0.0, %v2334_v1  ;;  %v2338_v13 = vadd.f32 %v2291_v22, %v957_v6 }
 0x2d3   : > { %1816 = vrcp.f32 %v1033_v4  ;;  %v1036_v16 = vadd.f32 1.0, %v1801_v8  ;;  %v1552_v41 = vpop.f32.mrf.mxu0 }
 0x2d4   : > { %v1803_v59 = vpop.eup %1802  ;;  %1818 = vpow2.f32 %v1017_v9  ;;  %v1023_v17 = vmul.f32 1.442695, %v996_v11  ;;  %v994_v50 = vsub.f32 0.0, %v2338_v13  ;;  %v2342_v29 = vadd.f32 %v1552_v41, %v2291_v22 }
 0x2d5   : > { %1820 = vrcp.f32 %v1036_v16  ;;  %v1034_v56 = vadd.f32 1.0, %v1803_v59  ;;  %v970_v3 = vpop.f32.mrf.mxu0 }
 0x2d6   : > { %v1805_v2 = vpop.eup %1804  ;;  %1822 = vpow2.f32 %v1023_v17  ;;  %v1019_v12 = vmul.f32 1.442695, %v994_v50  ;;  %v999_v19 = vsub.f32 0.0, %v2342_v29  ;;  %v2346_v43 = vadd.f32 %v2291_v22, %v970_v3 }
 0x2d7   : > { %1824 = vrcp.f32 %v1034_v56  ;;  %v1039_v21 = vadd.f32 1.0, %v1805_v2  ;;  %v1553_v23 = vpop.f32.mrf.mxu0 }
 0x2d8   : > { %v1807_v25 = vpop.eup %1806  ;;  %1826 = vpow2.f32 %v1019_v12  ;;  %v1029_v26 = vmul.f32 1.442695, %v999_v19  ;;  %v997_v27 = vsub.f32 0.0, %v2346_v43  ;;  %v2350_v28 = vadd.f32 %v1553_v23, %v2291_v22 }
 0x2d9   : > { %1828 = vrcp.f32 %v1039_v21  ;;  %v1037_v30 = vadd.f32 1.0, %v1807_v25  ;;  %v973_v33 = vpop.f32.mrf.mxu0 }
 0x2da   : > { %v1809_v35 = vpop.eup %1808  ;;  %1830 = vpow2.f32 %v1029_v26  ;;  %v1025_v37 = vmul.f32 1.442695, %v997_v27  ;;  %v1000_v55 = vsub.f32 0.0, %v2350_v28  ;;  %v2354_v63 = vadd.f32 %v2291_v22, %v973_v33 }
 0x2db   : > { %1832 = vrcp.f32 %v1037_v30  ;;  %v1040_v51 = vadd.f32 1.0, %v1809_v35 }
 0x2dc   : > { %v1811_v44 = vpop.eup %1810  ;;  %1834 = vpow2.f32 %v1025_v37  ;;  %v1031_v45 = vmul.f32 1.442695, %v1000_v55  ;;  %v998_v48 = vsub.f32 0.0, %v2354_v63 }
 0x2dd   : > { %1836 = vrcp.f32 %v1040_v51  ;;  %v1038_v5 = vadd.f32 1.0, %v1811_v44 }
 0x2de   : > { %v1813_v52 = vpop.eup %1812  ;;  %1838 = vpow2.f32 %v1031_v45  ;;  %v1027_v0 = vmul.f32 1.442695, %v998_v48  ;;  %v1400_v45 = vld [vmem:[%s2454_s6] ss:$0 sm:$0xff] }
 0x2df   : > { %v1815_v10 = vpop.eup %1814  ;;  %1840 = vrcp.f32 %v1038_v5  ;;  %v1067_v36 = vmul.f32 %v1813_v52, %v2294_v47 }
 0x2e0   : > { %v1817_v7 = vpop.eup %1816  ;;  %1842 = vpow2.f32 %v1027_v0  ;;  %v1043_v24 = vadd.f32 1.0, %v1815_v10 }
 0x2e1   : > { %v1819_v53 = vpop.eup %1818  ;;  %v1065_v34 = vmul.f32 %v1817_v7, %v2298_v58 }
 0x2e2   : > { %v1821_v18 = vpop.eup %1820  ;;  %v1041_v22 = vadd.f32 1.0, %v1819_v53 }
 0x2e3   : > { %v1823_v38 = vpop.eup %1822  ;;  %v1068_v54 = vmul.f32 %v1821_v18, %v2302_v31 }
 0x2e4   : > { %v1825_v46 = vpop.eup %1824  ;;  %v1044_v57 = vadd.f32 1.0, %v1823_v38  ;;  %1844 = vrcp.f32 %v1041_v22 }
 0x2e5   : > { %v1827_v60 = vpop.eup %1826  ;;  %v1066_v62 = vmul.f32 %v1825_v46, %v2306_v40  ;;  %v1082_v9 = vpack.c.bf16 %v1068_v54, %v1067_v36 }
 0x2e6   : > { %v1829_v20 = vpop.eup %1828  ;;  %1846 = vrcp.f32 %v1044_v57  ;;  %v1042_v15 = vadd.f32 1.0, %v1827_v60 }
 0x2e7   : > { %v1831_v4 = vpop.eup %1830  ;;  %1848 = vrcp.f32 %v1043_v24  ;;  %v1081_v6 = vpack.c.bf16 %v1066_v62, %v1065_v34  ;;  %v1071_v3 = vmul.f32 %v1829_v20, %v2310_v42 }
 0x2e8   : > { %v1833_v8 = vpop.eup %1832  ;;  %1850 = vrcp.f32 %v1042_v15  ;;  %v1047_v41 = vadd.f32 1.0, %v1831_v4 }
 0x2e9   : > { %v1835_v11 = vpop.eup %1834  ;;  %1570 = vmatprep.mubr.bf16.mxu0 %v1081_v6  ;;  %v1069_v50 = vmul.f32 %v1833_v8, %v2314_v49 }
 0x2ea   : > { %v1837_v31 = vpop.eup %1836  ;;  %v1045_v16 = vadd.f32 1.0, %v1835_v11  ;;  %1571 = vmatmul.mubr.bf16.vlgmr.msra.gmra.mxu0 %v1082_v9 }
 0x2eb   : > { %v1839_v58 = vpop.eup %1838  ;;  %v1072_v59 = vmul.f32 %v1837_v31, %v2318_v14 }
 0x2ec   : > { %v1841_v40 = vpop.eup %1840  ;;  %v1048_v17 = vadd.f32 1.0, %v1839_v58  ;;  %1852 = vrcp.f32 %v1045_v16 }
 0x2ed   : > { %v1843_v47 = vpop.eup %1842  ;;  %v1070_v56 = vmul.f32 %v1841_v40, %v2322_v61  ;;  %v1084_v19 = vpack.c.bf16 %v1072_v59, %v1071_v3 }
 0x2ee   : > { %1854 = vrcp.f32 %v1048_v17  ;;  %v1046_v2 = vadd.f32 1.0, %v1843_v47 }
 0x2ef   : > { %1856 = vrcp.f32 %v1047_v41  ;;  %v1083_v12 = vpack.c.bf16 %v1070_v56, %v1069_v50 }
 0x2f0   : > { %1858 = vrcp.f32 %v1046_v2 }
 0x2f1   : > { %1574 = vmatprep.mubr.bf16.mxu1 %v1083_v12  ;;  %v1845_v21 = vpop.eup %1844 }
 0x2f2   : > { %1575 = vmatmul.mubr.bf16.vlgmr.msra.gmra.mxu1 %v1084_v19  ;;  %v1073_v49 = vmul.f32 %v1845_v21, %v2330_v39 }
 0x2f3   : > { %v1847_v23 = vpop.eup %1846 }
 0x2f4   : > { %v1849_v14 = vpop.eup %1848  ;;  %v1076_v26 = vmul.f32 %v1847_v23, %v2334_v1 }
 0x2f5   : > { %v1851_v25 = vpop.eup %1850  ;;  %v1075_v42 = vmul.f32 %v1849_v14, %v2326_v32 }
 0x2f6   : > { %v1074_v61 = vmul.f32 %v1851_v25, %v2338_v13 }
 0x2f7   : > { %v1086_v30 = vpack.c.bf16 %v1076_v26, %v1075_v42 }
 0x2f8   : > { %v1085_v27 = vpack.c.bf16 %v1074_v61, %v1073_v49 }
 0x2f9   : > { %v1853_v33 = vpop.eup %1852 }
 0x2fa   : > { %1578 = vmatprep.mubr.bf16.mxu1 %v1085_v27  ;;  %v1077_v1 = vmul.f32 %v1853_v33, %v2346_v43 }
 0x2fb   : > { %v1855_v35 = vpop.eup %1854  ;;  %1579 = vmatmul.mubr.bf16.gmra.mxu1 %v1086_v30 }
 0x2fc   : > { %v1857_v37 = vpop.eup %1856  ;;  %v1080_v51 = vmul.f32 %v1855_v35, %v2350_v28 }
 0x2fd   : > { %v1859_v55 = vpop.eup %1858  ;;  %v1079_v13 = vmul.f32 %v1857_v37, %v2342_v29 }
 0x2fe   : > { %v1078_v39 = vmul.f32 %v1859_v55, %v2354_v63 }
 0x2ff   : > { %v1088_v32 = vpack.c.bf16 %v1080_v51, %v1079_v13 }
 0x300   : > { %v1087_v44 = vpack.c.bf16 %v1078_v39, %v1077_v1 }
 0x302   : > { %1582 = vmatprep.mubr.bf16.mxu1 %v1087_v44 }
 0x303   : > { %1583 = vmatmul.mubr.bf16.gmra.mxu1 %v1088_v32 }
 0x3aa   : > { %v1572_v48 = vpop.f32.mrf.mxu0 }
 0x3ab   : > { %v1203_v5 = vadd.f32 %v1572_v48, %v1400_v45 }
 0x3ac   : > { %v1194_v28 = vpop.f32.mrf.mxu0 }
 0x3ad   : > { %1259 = vst [vmem:[%s2379_s22 + $0x10] sm:$0xff] %v1203_v5  ;;  %v1195_v29 = vadd.f32 %v1400_v45, %v1194_v28 }
 0x3ae   : > { %v1573_v43 = vpop.f32.mrf.mxu0 }
 0x3af   : > { %1257 = vst [vmem:[%s2379_s22] sm:$0xff] %v1195_v29  ;;  %v1206_v63 = vadd.f32 %v1573_v43, %v1400_v45 }
 0x3b0   : > { %v1197_v52 = vpop.f32.mrf.mxu0 }
 0x3b1   : > { %1260 = vst [vmem:[%s2379_s22 + $0x18] sm:$0xff] %v1206_v63  ;;  %v1198_v0 = vadd.f32 %v1400_v45, %v1197_v52 }
 0x3b2   : > { %v1576_v10 = vpop.f32.mrf.mxu1 }
 0x3b3   : > { %1258 = vst [vmem:[%s2379_s22 + $0x8] sm:$0xff] %v1198_v0  ;;  %v1219_v7 = vadd.f32 %v1576_v10, %v1400_v45 }
 0x3b4   : > { %v1210_v53 = vpop.f32.mrf.mxu1 }
 0x3b5   : > { %1263 = vst [vmem:[%s2379_s22 + $0x30] sm:$0xff] %v1219_v7  ;;  %v1211_v18 = vadd.f32 %v1400_v45, %v1210_v53 }
 0x3b6   : > { %v1577_v22 = vpop.f32.mrf.mxu1 }
 0x3b7   : > { %1261 = vst [vmem:[%s2379_s22 + $0x20] sm:$0xff] %v1211_v18  ;;  %v1222_v38 = vadd.f32 %v1577_v22, %v1400_v45 }
 0x3b8   : > { %v1213_v24 = vpop.f32.mrf.mxu1 }
 0x3b9   : > { %1264 = vst [vmem:[%s2379_s22 + $0x38] sm:$0xff] %v1222_v38  ;;  %v1214_v46 = vadd.f32 %v1400_v45, %v1213_v24 }
 0x3bb   : > { %1262 = vst [vmem:[%s2379_s22 + $0x28] sm:$0xff] %v1214_v46  ;;  %v1580_v54 = vpop.f32.mrf.mxu1 }
 0x3bc   : > { %v1235_v57 = vadd.f32 %v1580_v54, %v1400_v45 }
 0x3bd   : > { %v1226_v60 = vpop.f32.mrf.mxu1 }
 0x3be   : > { %1267 = vst [vmem:[%s2379_s22 + $0x50] sm:$0xff] %v1235_v57  ;;  %v1227_v34 = vadd.f32 %v1400_v45, %v1226_v60 }
 0x3bf   : > { %v1581_v62 = vpop.f32.mrf.mxu1 }
 0x3c0   : > { %1265 = vst [vmem:[%s2379_s22 + $0x40] sm:$0xff] %v1227_v34  ;;  %v1238_v20 = vadd.f32 %v1581_v62, %v1400_v45 }
 0x3c1   : > { %v1229_v36 = vpop.f32.mrf.mxu1 }
 0x3c2   : > { %1268 = vst [vmem:[%s2379_s22 + $0x58] sm:$0xff] %v1238_v20  ;;  %v1230_v15 = vadd.f32 %v1400_v45, %v1229_v36 }
 0x3c3   : > { %v1584_v4 = vpop.f32.mrf.mxu1 }
 0x3c4   : > { %1266 = vst [vmem:[%s2379_s22 + $0x48] sm:$0xff] %v1230_v15  ;;  %v1251_v6 = vadd.f32 %v1584_v4, %v1400_v45 }
 0x3c5   : > { %v1242_v8 = vpop.f32.mrf.mxu1 }
 0x3c6   : > { %1271 = vst [vmem:[%s2379_s22 + $0x70] sm:$0xff] %v1251_v6  ;;  %v1243_v9 = vadd.f32 %v1400_v45, %v1242_v8 }
 0x3c7   : > { %v1585_v11 = vpop.f32.mrf.mxu1 }
 0x3c8   : > { %1269 = vst [vmem:[%s2379_s22 + $0x60] sm:$0xff] %v1243_v9  ;;  %v1254_v31 = vadd.f32 %v1585_v11, %v1400_v45 }
 0x3c9   : > { %v1245_v16 = vpop.f32.mrf.mxu1 }
 0x3ca   : > { %1272 = vst [vmem:[%s2379_s22 + $0x78] sm:$0xff] %v1254_v31  ;;  %v1246_v58 = vadd.f32 %v1400_v45, %v1245_v16 }
 0x3cc   : > { %1270 = vst [vmem:[%s2379_s22 + $0x68] sm:$0xff] %v1246_v58 }
 0x3cd   : > { %1873 = shalt.err (!%p1870_p3)
}
 0x3ce   : > { %s1874_s18 = scalar_lea.hbm %s2400_s13, 2048  ;;  %s1878_s21 = scalar_lea.hbm %s2455_s7, 4096 }
 0x3cf   : > { %p1875_p4 = scmp.ne.s32.totalorder %s2400_s13, %s1874_s18  ;;  %p1879_p9 = scmp.lt.s32.totalorder %s2400_s13, %s2455_s7 }
 0x3d0   : > { %p1880_p10 = scmp.lt.s32.totalorder %s1878_s21, %s1874_s18 }
 0x3d1   : > { %p1876_p7 = pnand %p1875_p4, %p2003_p5 }
 0x3d2   : > { %p1881_p11 = por %p1880_p10, %p1879_p9 }
 0x3d3   : > { %p1877_p8 = pneg %p1876_p7 }
 0x3d5   : > { %p1882_p12 = pnand %p1881_p11, %p1877_p8 }
 0x3d7   : > { %1885 = shalt.err (!%p1882_p12)
}
 0x3d8   : > { %s1923_s8 = smov 128   ;;  %s1924_s9 = smov 8  }
 0x3d9   : > { %1603 = dma.vmem_to_hbm [thread:$0]  (%p2003_p5), %s2402_s29, 2048, %s2400_s13, %s2408_s28, %s1923_s8, %s1923_s8, %s1924_s9  }
 0x3da PF: > { %p1609_p13 = scmp.ge.s32.totalorder %s1920_s27, 2  ;;  %s1302_s14 = sand.u32 1, %s1908_s24  }
 0x3db   : > { %s1303_s15 = scalar_lea.sflag [#allocation3], %s1302_s14 }
 0x3dc   : > { %p1606_p0 = pnand %p1609_p13, %p2007_p6 }
 0x3de   : > { %p1607_p1 = pneg %p1606_p0 }
 0x3e0   : > { %1903 = dma.done.wait (%p1607_p1), %s1303_s15, 2048  }
 0x3e1   : > { %1905 = vsyncadd (%p1607_p1), %s1303_s15, 4294965248  ;;  %p17_p2 = scmp.ge.s32.totalorder %s1990_s30, 4   ;;  %s2458_s24 = smov %s1912_s25 }
 0x3e2   : > { %s2459_s25 = smov %s1916_s26  ;;  %s2460_s26 = smov %s2001_s10 }
 0x3e3   : > { %s2461_s27 = smov %s1990_s30  ;;  %19 = sbr.rel (!%p17_p2) target bundleno = 3 (0x3), region = 85 }
 0x3e8   :  { %1308 = vsyncpa [#allocation3], 1 }
 0x3e9   :  { %1310 = vsyncpa [#allocation3 + $0x1], 1 }

// kernel: tpu_custom_call.1
= control target key start
LH: loop header
LB: loop body
LE: loop exit
PB: predicated region body
PF: predicated region fallthrough
CT: control target
= control target key end

     0   :  { %12 = vsyncpa [#allocation3], 0  ;;  %s2448_s0 = inlined_call_operand.vmem [shape: f32[256,8], index: 0, kind: input, shape index: {}]   ;;  %s2449_s1 = inlined_call_operand.vmem [shape: bf16[8,128], index: 1, kind: input, shape index: {}]   ;;  %s2450_s2 = inlined_call_operand.vmem [shape: f32[1,128], index: 2, kind: input, shape index: {}]   ;;  %s2451_s3 = inlined_call_operand.vmem [shape: bf16[2,128,128], index: 3, kind: input, shape index: {}]   ;;  %s2452_s4 = inlined_call_operand.vmem [shape: f32[2,1,128], index: 4, kind: input, shape index: {}]   ;;  %s2453_s5 = inlined_call_operand.vmem [shape: bf16[128,128], index: 5, kind: input, shape index: {}]   ;;  %s2454_s6 = inlined_call_operand.vmem [shape: f32[1,128], index: 6, kind: input, shape index: {}]   ;;  %s2455_s7 = inlined_call_operand.hbm [shape: f32[256,128], index: 7, kind: output, shape index: {}]  }
   0x1   :  { %14 = vsyncpa [#allocation3 + $0x1], 0  ;;  %s1965_s24 = smov 0   ;;  %s1967_s25 = smov 0  }
   0x2   :  { %s1969_s26 = smov 0   ;;  %s1971_s27 = smov 0  }
   0x3 LB: > { %s1986_s28 = sadd.s32 4294967295, %s1920_s27   ;;  %s1349_s29 = sadd.s32 4294967294, %s1920_s27   ;;  %s1920_s27 = sphi %s1971_s27, %s2461_s27   ;;  %s1916_s26 = sphi %s1969_s26, %s2460_s26   ;;  %s1912_s25 = sphi %s1967_s25, %s2459_s25   ;;  %s1908_s24 = sphi %s1965_s24, %s2458_s24  }
   0x4   : > { %s1990_s30 = sadd.s32 1, %s1920_s27   ;;  %s179_s8 = sadd.s32 1, %s1916_s26 }
   0x5   : > { %s176_s9 = ssub.s32 %s1920_s27, %s1990_s30  ;;  %p189_p0 = scmp.ne.s32.totalorder %s1916_s26, %s1912_s25 }
   0x6   : > { %p177_p1 = scmp.eq.s32.totalorder %s176_s9, 0  ;;  %p190_p2 = scmp.eq.s32.totalorder %s1986_s28, 1 }
   0x7   : > { %p195_p3 = scmp.ne.s32.totalorder %s1912_s25, %s1908_s24  ;;  %p196_p4 = scmp.eq.s32.totalorder %s1349_s29, 1 }
   0x8   : > { %s2001_s10 = scalar_select %p177_p1, %s1916_s26, %s179_s8  }
   0x9   : > { %p2003_p5 = por %p190_p2, %p189_p0  ;;  %p2007_p6 = por %p196_p4, %p195_p3 }
   0xa   : > { %p1352_p7 = scmp.ge.s32.totalorder %s1920_s27, 1  ;;  %p241_p8 = scmp.lt.s32.totalorder %s1920_s27, 3 }
   0xc   : > { %p242_p9 = pnand %p1352_p7, %p241_p8 }
   0xd   : > { %s1354_s15 = sshll.u32 (!%p242_p9), %s1986_s28, 4  ;;  %s270_s18 = sand.u32 (!%p242_p9), 1, %s1912_s25  }
   0xe   : > { %245 = sbr.rel (%p242_p9) target bundleno = 986 (0x3da), region = 48  ;;  %p274_p10 = scmp.lt.s32.totalorder (!%p242_p9), %s1354_s15, 31 }
   0xf   : > { %s1414_s23 = sshll.u32 (!%p242_p9), %s1986_s28, 11  ;;  %s2408_s28 = scalar_lea.sflag (!%p242_p9), [#allocation3], %s270_s18 }
  0x10   : > { %s2400_s13 = scalar_lea.hbm (!%p242_p9), %s2455_s7, %s1414_s23 }
  0x13   : > { %v305_v0 = vld [vmem:[%s2449_s1] sm:$0xf]  ;;  %vm338_vm0 = vcmask 1043456   ;;  %s2463_s15 = smov (!%p274_p10, %s1354_s15), 31  ;;  %vm313_vm1 = vcmask 64512   ;;  %v1644_v26 = vld [vmem:[%s2451_s3 + $0x38] sm:$0xff]  }
  0x14   : > { %1602 = vmatprep.subr.msk.bf16.mxu0 %vm338_vm0, %v305_v0  ;;  %v340_v1 = vsel %vm338_vm0, %v305_v0, 0  ;;  %s1355_s16 = sshll.u32 %s2463_s15, 3  ;;  %1490 = vmatprep.subr.bf16.mxu1 %v1644_v26  ;;  %v1645_v27 = vld [vmem:[%s2451_s3 + $0x30] sm:$0xff]   ;;  %v1646_v28 = vld [vmem:[%s2451_s3 + $0x28] sm:$0xff]   ;;  %v1647_v29 = vld [vmem:[%s2451_s3 + $0x20] sm:$0xff]   ;;  %s1922_s15 = smov [#allocation2]  }
  0x15   : > { %1473 = vmatpush3.bf16.msra.mxu0 %v340_v1  ;;  %s2020_s19 = scalar_lea.vmem %s2448_s0, %s1355_s16  ;;  %1491 = vmatpush3.bf16.msra.mxu1 %v1644_v26  ;;  %v1648_v30 = vld [vmem:[%s2451_s3 + $0x18] sm:$0xff]   ;;  %v1649_v31 = vld [vmem:[%s2451_s3 + $0x10] sm:$0xff]   ;;  %v1650_v32 = vld [vmem:[%s2451_s3 + $0x8] sm:$0xff]   ;;  %s1864_s16 = sshll.u32 %s1922_s15, 4  ;;  %s1865_s16 = int_to_ptr.vmem [resolvable:$false] %s1864_s16 }
  0x16   : > { %v281_v2 = vld [vmem:[%s2020_s19] sm:$0xff]  ;;  %v282_v3 = vld [vmem:[%s2020_s19 + $0x8] sm:$0xff]  ;;  %v283_v4 = vld [vmem:[%s2020_s19 + $0x10] sm:$0xff]  ;;  %1492 = vmatprep.subr.bf16.mxu1 %v1645_v27  ;;  %s1866_s17 = scalar_lea.vmem %s1865_s16, 4096 }
  0x17   : > { %v297_v5 = vpack.c.bf16 %v282_v3, %v281_v2  ;;  %v284_v6 = vld [vmem:[%s2020_s19 + $0x18] sm:$0xff]  ;;  %v285_v7 = vld [vmem:[%s2020_s19 + $0x20] sm:$0xff]  ;;  %v286_v8 = vld [vmem:[%s2020_s19 + $0x28] sm:$0xff] }
  0x18   : > { %v298_v9 = vpack.c.bf16 %v284_v6, %v283_v4  ;;  %v299_v10 = vpack.c.bf16 %v286_v8, %v285_v7  ;;  %v287_v11 = vld [vmem:[%s2020_s19 + $0x30] sm:$0xff]  ;;  %v288_v12 = vld [vmem:[%s2020_s19 + $0x38] sm:$0xff]  ;;  %v289_v13 = vld [vmem:[%s2020_s19 + $0x40] sm:$0xff] }
  0x19   : > { %1474 = vmatprep.mubr.msk.bf16.mxu0 %vm313_vm1, %v297_v5  ;;  %v290_v14 = vld [vmem:[%s2020_s19 + $0x48] sm:$0xff]  ;;  %v300_v15 = vpack.c.bf16 %v288_v12, %v287_v11  ;;  %v291_v17 = vld [vmem:[%s2020_s19 + $0x50] sm:$0xff]  ;;  %v292_v18 = vld [vmem:[%s2020_s19 + $0x58] sm:$0xff]  ;;  %1493 = vmatpush3.bf16.msra.mxu1 %v1645_v27 }
  0x1a   : > { %1475 = vmatmul.mubr.msk.bf16.vlgmr.msra.gmra.mxu0 %vm313_vm1, %v298_v9  ;;  %v301_v16 = vpack.c.bf16 %v290_v14, %v289_v13  ;;  %v293_v19 = vld [vmem:[%s2020_s19 + $0x60] sm:$0xff]  ;;  %v294_v20 = vld [vmem:[%s2020_s19 + $0x68] sm:$0xff]  ;;  %v302_v21 = vpack.c.bf16 %v292_v18, %v291_v17  ;;  %v295_v23 = vld [vmem:[%s2020_s19 + $0x70] sm:$0xff]  ;;  %1494 = vmatprep.subr.bf16.mxu1 %v1646_v28 }
  0x1b   : > { %1478 = vmatprep.mubr.msk.bf16.mxu0 %vm313_vm1, %v299_v10  ;;  %v303_v22 = vpack.c.bf16 %v294_v20, %v293_v19  ;;  %v296_v24 = vld [vmem:[%s2020_s19 + $0x78] sm:$0xff]  ;;  %v1651_v33 = vld [vmem:[%s2451_s3] sm:$0xff]   ;;  %s1353_s19 = sshll.u32 %s270_s18, 7 }
  0x1c   : > { %v304_v25 = vpack.c.bf16 %v296_v24, %v295_v23  ;;  %v2073_v34 = vld [vmem:[%s2450_s2] ss:$0 sm:$0xff]  ;;  %s2379_s22 = scalar_lea.vmem [#allocation2], %s1353_s19 }
  0x1d   : > { %1495 = vmatpush3.bf16.msra.mxu1 %v1646_v28  ;;  %s1287_s29 = sshll.u32 %s2379_s22, 4  ;;  %s2402_s29 = int_to_ptr.vmem [resolvable:$true] %s1287_s29 }
  0x1e   : > { %1496 = vmatprep.subr.bf16.mxu1 %v1647_v29  ;;  %s1860_s14 = scalar_lea.vmem %s2402_s29, 2048  ;;  %p1867_p0 = scmp.lt.s32.totalorder %s2402_s29, %s1865_s16 }
  0x1f   : > { %p1861_p11 = scmp.ne.s32.totalorder %s2402_s29, %s1860_s14  ;;  %p1868_p1 = scmp.lt.s32.totalorder %s1866_s17, %s1860_s14 }
  0x21   : > { %1497 = vmatpush3.bf16.msra.mxu1 %v1647_v29  ;;  %p1862_p12 = pnand %p1861_p11, %p2003_p5  ;;  %p1869_p2 = por %p1868_p1, %p1867_p0 }
  0x22   : > { %1479 = vmatmul.mubr.msk.bf16.gmra.mxu0 %vm313_vm1, %v300_v15  ;;  %1498 = vmatprep.subr.bf16.mxu1 %v1648_v30 }
  0x23   : > { %1482 = vmatprep.mubr.msk.bf16.mxu0 %vm313_vm1, %v301_v16  ;;  %p1863_p13 = pneg %p1862_p12 }
  0x25   : > { %1499 = vmatpush3.bf16.msra.mxu1 %v1648_v30  ;;  %p1870_p3 = pnand %p1869_p2, %p1863_p13 }
  0x26   : > { %1500 = vmatprep.subr.bf16.mxu1 %v1649_v31 }
  0x29   : > { %1501 = vmatpush3.bf16.msra.mxu1 %v1649_v31 }
  0x2a   : > { %1483 = vmatmul.mubr.msk.bf16.gmra.mxu0 %vm313_vm1, %v302_v21  ;;  %1502 = vmatprep.subr.bf16.mxu1 %v1650_v32 }
  0x2b   : > { %1486 = vmatprep.mubr.msk.bf16.mxu0 %vm313_vm1, %v303_v22 }
  0x2d   : > { %1503 = vmatpush3.bf16.msra.mxu1 %v1650_v32 }
  0x2e   : > { %1504 = vmatprep.subr.bf16.mxu1 %v1651_v33 }
  0x31   : > { %1505 = vmatpush3.bf16.msra.mxu1 %v1651_v33 }
  0x32   : > { %1487 = vmatmul.mubr.msk.bf16.gmra.mxu0 %vm313_vm1, %v304_v25 }
  0xda   : > { %v1476_v35 = vpop.f32.mrf.mxu0 }
  0xdb   : > { %v2076_v36 = vadd.f32 %v1476_v35, %v2073_v34 }
  0xdc   : > { %v376_v37 = vpop.f32.mrf.mxu0 }
  0xdd   : > { %v441_v38 = vsub.f32 0.0, %v2076_v36  ;;  %v2080_v39 = vadd.f32 %v2073_v34, %v376_v37 }
  0xde   : > { %v1477_v40 = vpop.f32.mrf.mxu0 }
  0xdf   : > { %v459_v41 = vmul.f32 1.442695, %v441_v38  ;;  %v439_v42 = vsub.f32 0.0, %v2080_v39  ;;  %v2084_v43 = vadd.f32 %v1477_v40, %v2073_v34 }
  0xe0   : > { %v379_v44 = vpop.f32.mrf.mxu0 }
  0xe1   : > { %1668 = vpow2.f32 %v459_v41  ;;  %v455_v45 = vmul.f32 1.442695, %v439_v42  ;;  %v442_v46 = vsub.f32 0.0, %v2084_v43  ;;  %v2088_v47 = vadd.f32 %v2073_v34, %v379_v44 }
  0xe2   : > { %v1480_v48 = vpop.f32.mrf.mxu0 }
  0xe3   : > { %1670 = vpow2.f32 %v455_v45  ;;  %v461_v49 = vmul.f32 1.442695, %v442_v46  ;;  %v440_v50 = vsub.f32 0.0, %v2088_v47  ;;  %v2092_v51 = vadd.f32 %v1480_v48, %v2073_v34 }
  0xe4   : > { %v392_v52 = vpop.f32.mrf.mxu0 }
  0xe5   : > { %1672 = vpow2.f32 %v461_v49  ;;  %v457_v53 = vmul.f32 1.442695, %v440_v50  ;;  %v445_v54 = vsub.f32 0.0, %v2092_v51  ;;  %v2096_v55 = vadd.f32 %v2073_v34, %v392_v52 }
  0xe6   : > { %v1481_v56 = vpop.f32.mrf.mxu0 }
  0xe7   : > { %1674 = vpow2.f32 %v457_v53  ;;  %v467_v57 = vmul.f32 1.442695, %v445_v54  ;;  %v443_v58 = vsub.f32 0.0, %v2096_v55  ;;  %v2100_v59 = vadd.f32 %v1481_v56, %v2073_v34 }
  0xe8   : > { %v395_v60 = vpop.f32.mrf.mxu0 }
  0xe9   : > { %1676 = vpow2.f32 %v467_v57  ;;  %v463_v61 = vmul.f32 1.442695, %v443_v58  ;;  %v446_v62 = vsub.f32 0.0, %v2100_v59  ;;  %v2104_v63 = vadd.f32 %v2073_v34, %v395_v60 }
  0xea   : > { %v1484_v0 = vpop.f32.mrf.mxu0 }
  0xeb   : > { %1678 = vpow2.f32 %v463_v61  ;;  %v469_v1 = vmul.f32 1.442695, %v446_v62  ;;  %v444_v2 = vsub.f32 0.0, %v2104_v63  ;;  %v2108_v3 = vadd.f32 %v1484_v0, %v2073_v34 }
  0xec   : > { %v408_v4 = vpop.f32.mrf.mxu0 }
  0xed   : > { %1680 = vpow2.f32 %v469_v1  ;;  %v465_v5 = vmul.f32 1.442695, %v444_v2  ;;  %v449_v6 = vsub.f32 0.0, %v2108_v3  ;;  %v2112_v7 = vadd.f32 %v2073_v34, %v408_v4 }
  0xee   : > { %v1669_v8 = vpop.eup %1668  ;;  %v1485_v9 = vpop.f32.mrf.mxu0 }
  0xef   : > { %v489_v10 = vadd.f32 1.0, %v1669_v8  ;;  %1682 = vpow2.f32 %v465_v5  ;;  %v475_v11 = vmul.f32 1.442695, %v449_v6  ;;  %v447_v12 = vsub.f32 0.0, %v2112_v7 }
  0xf0   : > { %v1671_v13 = vpop.eup %1670  ;;  %v2116_v14 = vadd.f32 %v1485_v9, %v2073_v34  ;;  %v411_v15 = vpop.f32.mrf.mxu0 }
  0xf1   : > { %1684 = vrcp.f32 %v489_v10  ;;  %v487_v16 = vadd.f32 1.0, %v1671_v13  ;;  %v471_v17 = vmul.f32 1.442695, %v447_v12  ;;  %v2119_v18 = vadd.f32 %v2073_v34, %v411_v15 }
  0xf2   : > { %v1673_v19 = vpop.eup %1672  ;;  %1686 = vpow2.f32 %v475_v11  ;;  %v450_v20 = vsub.f32 0.0, %v2116_v14  ;;  %v1488_v21 = vpop.f32.mrf.mxu0 }
  0xf3   : > { %1688 = vrcp.f32 %v487_v16  ;;  %v490_v22 = vadd.f32 1.0, %v1673_v19  ;;  %v448_v23 = vsub.f32 0.0, %v2119_v18  ;;  %v2124_v24 = vadd.f32 %v1488_v21, %v2073_v34 }
  0xf4   : > { %v1675_v25 = vpop.eup %1674  ;;  %1690 = vpow2.f32 %v471_v17  ;;  %v477_v26 = vmul.f32 1.442695, %v450_v20  ;;  %v424_v27 = vpop.f32.mrf.mxu0 }
  0xf5   : > { %1692 = vrcp.f32 %v490_v22  ;;  %v488_v28 = vadd.f32 1.0, %v1675_v25  ;;  %v473_v29 = vmul.f32 1.442695, %v448_v23  ;;  %v453_v30 = vsub.f32 0.0, %v2124_v24 }
  0xf6   : > { %v1677_v31 = vpop.eup %1676  ;;  %1694 = vpow2.f32 %v477_v26  ;;  %v2128_v32 = vadd.f32 %v2073_v34, %v424_v27  ;;  %v1489_v33 = vpop.f32.mrf.mxu0 }
  0xf7   : > { %1696 = vrcp.f32 %v488_v28  ;;  %v493_v35 = vadd.f32 1.0, %v1677_v31  ;;  %v483_v37 = vmul.f32 1.442695, %v453_v30  ;;  %v2131_v38 = vadd.f32 %v1489_v33, %v2073_v34 }
  0xf8   : > { %v1679_v40 = vpop.eup %1678  ;;  %1698 = vpow2.f32 %v473_v29  ;;  %v451_v41 = vsub.f32 0.0, %v2128_v32  ;;  %v427_v42 = vpop.f32.mrf.mxu0 }
  0xf9   : > { %1700 = vrcp.f32 %v493_v35  ;;  %v491_v44 = vadd.f32 1.0, %v1679_v40  ;;  %v454_v45 = vsub.f32 0.0, %v2131_v38  ;;  %v2136_v46 = vadd.f32 %v2073_v34, %v427_v42 }
  0xfa   : > { %v1681_v48 = vpop.eup %1680  ;;  %1702 = vpow2.f32 %v483_v37  ;;  %v479_v49 = vmul.f32 1.442695, %v451_v41 }
  0xfb   : > { %1704 = vrcp.f32 %v491_v44  ;;  %v494_v50 = vadd.f32 1.0, %v1681_v48  ;;  %v485_v52 = vmul.f32 1.442695, %v454_v45  ;;  %v452_v53 = vsub.f32 0.0, %v2136_v46 }
  0xfc   : > { %v1683_v54 = vpop.eup %1682  ;;  %1706 = vpow2.f32 %v479_v49 }
  0xfd   : > { %1708 = vrcp.f32 %v494_v50  ;;  %v492_v56 = vadd.f32 1.0, %v1683_v54  ;;  %v481_v57 = vmul.f32 1.442695, %v452_v53  ;;  %v1657_v54 = vld [vmem:[%s2451_s3 + $0x50] sm:$0xff]  }
  0xfe   : > { %v1685_v58 = vpop.eup %1684  ;;  %1710 = vpow2.f32 %v485_v52 }
  0xff   : > { %v1687_v60 = vpop.eup %1686  ;;  %1712 = vrcp.f32 %v492_v56  ;;  %v521_v12 = vmul.f32 %v1685_v58, %v2076_v36  ;;  %v1658_v56 = vld [vmem:[%s2451_s3 + $0x48] sm:$0xff]   ;;  %v2182_v58 = vld [vmem:[%s2452_s4] ss:$0 sm:$0xff] }
 0x100   : > { %v1689_v61 = vpop.eup %1688  ;;  %1714 = vpow2.f32 %v481_v57  ;;  %v497_v2 = vadd.f32 1.0, %v1687_v60  ;;  %v1659_v57 = vld [vmem:[%s2451_s3 + $0x40] sm:$0xff]  }
 0x101   : > { %v1691_v34 = vpop.eup %1690  ;;  %v519_v9 = vmul.f32 %v1689_v61, %v2080_v39 }
 0x102   : > { %v1693_v62 = vpop.eup %1692  ;;  %v495_v0 = vadd.f32 1.0, %v1691_v34 }
 0x103   : > { %v1695_v1 = vpop.eup %1694  ;;  %v522_v5 = vmul.f32 %v1693_v62, %v2084_v43 }
 0x104   : > { %v1697_v4 = vpop.eup %1696  ;;  %v498_v6 = vadd.f32 1.0, %v1695_v1  ;;  %1716 = vrcp.f32 %v495_v0 }
 0x105   : > { %v1699_v8 = vpop.eup %1698  ;;  %v520_v10 = vmul.f32 %v1697_v4, %v2088_v47  ;;  %v536_v19 = vpack.c.bf16 %v522_v5, %v521_v12 }
 0x106   : > { %v1701_v11 = vpop.eup %1700  ;;  %1718 = vrcp.f32 %v498_v6  ;;  %v496_v13 = vadd.f32 1.0, %v1699_v8 }
 0x107   : > { %v1703_v15 = vpop.eup %1702  ;;  %1720 = vrcp.f32 %v497_v2  ;;  %v535_v16 = vpack.c.bf16 %v520_v10, %v519_v9  ;;  %v525_v28 = vmul.f32 %v1701_v11, %v2092_v51 }
 0x108   : > { %v1705_v17 = vpop.eup %1704  ;;  %1722 = vrcp.f32 %v496_v13  ;;  %v501_v39 = vadd.f32 1.0, %v1703_v15 }
 0x109   : > { %v1707_v20 = vpop.eup %1706  ;;  %1506 = vmatprep.mubr.bf16.mxu1 %v535_v16  ;;  %v523_v26 = vmul.f32 %v1705_v17, %v2096_v55 }
 0x10a   : > { %v1709_v43 = vpop.eup %1708  ;;  %v499_v21 = vadd.f32 1.0, %v1707_v20  ;;  %1507 = vmatmul.mubr.bf16.vlgmr.msra.gmra.mxu1 %v536_v19 }
 0x10b   : > { %v1711_v22 = vpop.eup %1710  ;;  %v526_v47 = vmul.f32 %v1709_v43, %v2100_v59 }
 0x10c   : > { %v1713_v23 = vpop.eup %1712  ;;  %v502_v25 = vadd.f32 1.0, %v1711_v22  ;;  %1724 = vrcp.f32 %v499_v21 }
 0x10d   : > { %v1715_v36 = vpop.eup %1714  ;;  %v524_v27 = vmul.f32 %v1713_v23, %v2104_v63  ;;  %v538_v31 = vpack.c.bf16 %v526_v47, %v525_v28 }
 0x10e   : > { %1726 = vrcp.f32 %v502_v25  ;;  %v500_v29 = vadd.f32 1.0, %v1715_v36 }
 0x10f   : > { %1728 = vrcp.f32 %v501_v39  ;;  %v537_v30 = vpack.c.bf16 %v524_v27, %v523_v26 }
 0x110   : > { %1730 = vrcp.f32 %v500_v29 }
 0x111   : > { %1510 = vmatprep.mubr.bf16.mxu1 %v537_v30  ;;  %v1717_v33 = vpop.eup %1716 }
 0x112   : > { %1511 = vmatmul.mubr.bf16.gmra.mxu1 %v538_v31  ;;  %v527_v55 = vmul.f32 %v1717_v33, %v2112_v7 }
 0x113   : > { %v1719_v35 = vpop.eup %1718 }
 0x114   : > { %v1721_v59 = vpop.eup %1720  ;;  %v530_v40 = vmul.f32 %v1719_v35, %v2116_v14 }
 0x115   : > { %v1723_v37 = vpop.eup %1722  ;;  %v529_v51 = vmul.f32 %v1721_v59, %v2108_v3  ;;  %v1652_v3 = vld [vmem:[%s2451_s3 + $0x78] sm:$0xff]  }
 0x116   : > { %v528_v63 = vmul.f32 %v1723_v37, %v2119_v18  ;;  %1522 = vmatprep.subr.bf16.mxu0 %v1652_v3 }
 0x117   : > { %v540_v42 = vpack.c.bf16 %v530_v40, %v529_v51  ;;  %1523 = vmatpush3.bf16.msra.mxu0 %v1652_v3 }
 0x118   : > { %v539_v41 = vpack.c.bf16 %v528_v63, %v527_v55 }
 0x119   : > { %v1725_v44 = vpop.eup %1724 }
 0x11a   : > { %1514 = vmatprep.mubr.bf16.mxu1 %v539_v41  ;;  %v531_v52 = vmul.f32 %v1725_v44, %v2128_v32  ;;  %v1655_v32 = vld [vmem:[%s2451_s3 + $0x60] sm:$0xff]  }
 0x11b   : > { %v1727_v45 = vpop.eup %1726  ;;  %1515 = vmatmul.mubr.bf16.gmra.mxu1 %v540_v42 }
 0x11c   : > { %v1729_v48 = vpop.eup %1728  ;;  %v534_v50 = vmul.f32 %v1727_v45, %v2131_v38  ;;  %v1653_v38 = vld [vmem:[%s2451_s3 + $0x70] sm:$0xff]  }
 0x11d   : > { %v1731_v49 = vpop.eup %1730  ;;  %v533_v7 = vmul.f32 %v1729_v48, %v2124_v24  ;;  %1524 = vmatprep.subr.bf16.mxu0 %v1653_v38  ;;  %v1654_v24 = vld [vmem:[%s2451_s3 + $0x68] sm:$0xff]  }
 0x11e   : > { %v532_v14 = vmul.f32 %v1731_v49, %v2136_v46  ;;  %1525 = vmatpush3.bf16.msra.mxu0 %v1653_v38  ;;  %v1656_v46 = vld [vmem:[%s2451_s3 + $0x58] sm:$0xff]  }
 0x11f   : > { %v542_v18 = vpack.c.bf16 %v534_v50, %v533_v7  ;;  %1526 = vmatprep.subr.bf16.mxu0 %v1654_v24 }
 0x120   : > { %v541_v53 = vpack.c.bf16 %v532_v14, %v531_v52 }
 0x122   : > { %1518 = vmatprep.mubr.bf16.mxu1 %v541_v53  ;;  %1527 = vmatpush3.bf16.msra.mxu0 %v1654_v24 }
 0x123   : > { %1519 = vmatmul.mubr.bf16.gmra.mxu1 %v542_v18  ;;  %1528 = vmatprep.subr.bf16.mxu0 %v1655_v32 }
 0x126   : > { %1529 = vmatpush3.bf16.msra.mxu0 %v1655_v32 }
 0x127   : > { %1530 = vmatprep.subr.bf16.mxu0 %v1656_v46 }
 0x12a   : > { %1531 = vmatpush3.bf16.msra.mxu0 %v1656_v46 }
 0x12b   : > { %1532 = vmatprep.subr.bf16.mxu0 %v1657_v54 }
 0x12e   : > { %1533 = vmatpush3.bf16.msra.mxu0 %v1657_v54 }
 0x12f   : > { %1534 = vmatprep.subr.bf16.mxu0 %v1658_v56 }
 0x132   : > { %1535 = vmatpush3.bf16.msra.mxu0 %v1658_v56 }
 0x133   : > { %1536 = vmatprep.subr.bf16.mxu0 %v1659_v57 }
 0x136   : > { %1537 = vmatpush3.bf16.msra.mxu0 %v1659_v57 }
 0x1ca   : > { %v1508_v60 = vpop.f32.mrf.mxu1 }
 0x1cb   : > { %v2185_v61 = vadd.f32 %v1508_v60, %v2182_v58 }
 0x1cc   : > { %v648_v34 = vpop.f32.mrf.mxu1 }
 0x1cd   : > { %v713_v62 = vsub.f32 0.0, %v2185_v61  ;;  %v2189_v0 = vadd.f32 %v2182_v58, %v648_v34 }
 0x1ce   : > { %v1509_v1 = vpop.f32.mrf.mxu1 }
 0x1cf   : > { %v731_v2 = vmul.f32 1.442695, %v713_v62  ;;  %v711_v4 = vsub.f32 0.0, %v2189_v0  ;;  %v2193_v5 = vadd.f32 %v1509_v1, %v2182_v58 }
 0x1d0   : > { %v651_v6 = vpop.f32.mrf.mxu1 }
 0x1d1   : > { %1732 = vpow2.f32 %v731_v2  ;;  %v727_v8 = vmul.f32 1.442695, %v711_v4  ;;  %v714_v9 = vsub.f32 0.0, %v2193_v5  ;;  %v2197_v10 = vadd.f32 %v2182_v58, %v651_v6 }
 0x1d2   : > { %v1512_v11 = vpop.f32.mrf.mxu1 }
 0x1d3   : > { %1734 = vpow2.f32 %v727_v8  ;;  %v733_v12 = vmul.f32 1.442695, %v714_v9  ;;  %v712_v13 = vsub.f32 0.0, %v2197_v10  ;;  %v2201_v15 = vadd.f32 %v1512_v11, %v2182_v58 }
 0x1d4   : > { %v664_v16 = vpop.f32.mrf.mxu1 }
 0x1d5   : > { %1736 = vpow2.f32 %v733_v12  ;;  %v729_v17 = vmul.f32 1.442695, %v712_v13  ;;  %v717_v19 = vsub.f32 0.0, %v2201_v15  ;;  %v2205_v20 = vadd.f32 %v2182_v58, %v664_v16 }
 0x1d6   : > { %v1513_v43 = vpop.f32.mrf.mxu1 }
 0x1d7   : > { %1738 = vpow2.f32 %v729_v17  ;;  %v739_v21 = vmul.f32 1.442695, %v717_v19  ;;  %v715_v22 = vsub.f32 0.0, %v2205_v20  ;;  %v2209_v39 = vadd.f32 %v1513_v43, %v2182_v58 }
 0x1d8   : > { %v667_v23 = vpop.f32.mrf.mxu1 }
 0x1d9   : > { %1740 = vpow2.f32 %v739_v21  ;;  %v735_v47 = vmul.f32 1.442695, %v715_v22  ;;  %v718_v25 = vsub.f32 0.0, %v2209_v39  ;;  %v2213_v36 = vadd.f32 %v2182_v58, %v667_v23 }
 0x1db   : > { %1742 = vpow2.f32 %v735_v47  ;;  %v741_v26 = vmul.f32 1.442695, %v718_v25  ;;  %v716_v27 = vsub.f32 0.0, %v2213_v36  ;;  %v1516_v28 = vpop.f32.mrf.mxu1 }
 0x1dc   : > { %v2217_v29 = vadd.f32 %v1516_v28, %v2182_v58 }
 0x1dd   : > { %1744 = vpow2.f32 %v741_v26  ;;  %v737_v30 = vmul.f32 1.442695, %v716_v27  ;;  %v680_v31 = vpop.f32.mrf.mxu1 }
 0x1de   : > { %v1733_v33 = vpop.eup %1732  ;;  %v721_v35 = vsub.f32 0.0, %v2217_v29  ;;  %v2221_v59 = vadd.f32 %v2182_v58, %v680_v31 }
 0x1df   : > { %v761_v37 = vadd.f32 1.0, %v1733_v33  ;;  %1746 = vpow2.f32 %v737_v30  ;;  %v1517_v40 = vpop.f32.mrf.mxu1 }
 0x1e0   : > { %v1735_v55 = vpop.eup %1734  ;;  %v747_v63 = vmul.f32 1.442695, %v721_v35  ;;  %v719_v51 = vsub.f32 0.0, %v2221_v59  ;;  %v2225_v41 = vadd.f32 %v1517_v40, %v2182_v58 }
 0x1e1   : > { %1748 = vrcp.f32 %v761_v37  ;;  %v759_v42 = vadd.f32 1.0, %v1735_v55  ;;  %v683_v44 = vpop.f32.mrf.mxu1 }
 0x1e2   : > { %v1737_v45 = vpop.eup %1736  ;;  %1750 = vpow2.f32 %v747_v63  ;;  %v743_v48 = vmul.f32 1.442695, %v719_v51  ;;  %v722_v49 = vsub.f32 0.0, %v2225_v41  ;;  %v2229_v50 = vadd.f32 %v2182_v58, %v683_v44 }
 0x1e3   : > { %1752 = vrcp.f32 %v759_v42  ;;  %v762_v52 = vadd.f32 1.0, %v1737_v45  ;;  %v1520_v14 = vpop.f32.mrf.mxu1 }
 0x1e4   : > { %v1739_v7 = vpop.eup %1738  ;;  %1754 = vpow2.f32 %v743_v48  ;;  %v749_v53 = vmul.f32 1.442695, %v722_v49  ;;  %v720_v18 = vsub.f32 0.0, %v2229_v50  ;;  %v2233_v3 = vadd.f32 %v1520_v14, %v2182_v58 }
 0x1e5   : > { %1756 = vrcp.f32 %v762_v52  ;;  %v760_v38 = vadd.f32 1.0, %v1739_v7  ;;  %v696_v24 = vpop.f32.mrf.mxu1 }
 0x1e6   : > { %v1741_v32 = vpop.eup %1740  ;;  %1758 = vpow2.f32 %v749_v53  ;;  %v745_v46 = vmul.f32 1.442695, %v720_v18  ;;  %v725_v54 = vsub.f32 0.0, %v2233_v3  ;;  %v2237_v56 = vadd.f32 %v2182_v58, %v696_v24 }
 0x1e7   : > { %1760 = vrcp.f32 %v760_v38  ;;  %v765_v57 = vadd.f32 1.0, %v1741_v32  ;;  %v1521_v60 = vpop.f32.mrf.mxu1 }
 0x1e8   : > { %v1743_v34 = vpop.eup %1742  ;;  %1762 = vpow2.f32 %v745_v46  ;;  %v755_v62 = vmul.f32 1.442695, %v725_v54  ;;  %v723_v1 = vsub.f32 0.0, %v2237_v56  ;;  %v2241_v2 = vadd.f32 %v1521_v60, %v2182_v58 }
 0x1e9   : > { %1764 = vrcp.f32 %v765_v57  ;;  %v763_v4 = vadd.f32 1.0, %v1743_v34  ;;  %v699_v6 = vpop.f32.mrf.mxu1 }
 0x1ea   : > { %v1745_v8 = vpop.eup %1744  ;;  %1766 = vpow2.f32 %v755_v62  ;;  %v751_v9 = vmul.f32 1.442695, %v723_v1  ;;  %v726_v11 = vsub.f32 0.0, %v2241_v2  ;;  %v2245_v12 = vadd.f32 %v2182_v58, %v699_v6 }
 0x1eb   : > { %1768 = vrcp.f32 %v763_v4  ;;  %v766_v13 = vadd.f32 1.0, %v1745_v8 }
 0x1ec   : > { %v1747_v16 = vpop.eup %1746  ;;  %1770 = vpow2.f32 %v751_v9  ;;  %v757_v17 = vmul.f32 1.442695, %v726_v11  ;;  %v724_v19 = vsub.f32 0.0, %v2245_v12 }
 0x1ed   : > { %1772 = vrcp.f32 %v766_v13  ;;  %v764_v43 = vadd.f32 1.0, %v1747_v16 }
 0x1ee   : > { %v1749_v21 = vpop.eup %1748  ;;  %1774 = vpow2.f32 %v757_v17  ;;  %v753_v22 = vmul.f32 1.442695, %v724_v19  ;;  %v1665_v19 = vld [vmem:[%s2453_s5 + $0x10] sm:$0xff]  }
 0x1ef   : > { %v1751_v23 = vpop.eup %1750  ;;  %1776 = vrcp.f32 %v764_v43  ;;  %v793_v63 = vmul.f32 %v1749_v21, %v2185_v61  ;;  %v1666_v43 = vld [vmem:[%s2453_s5 + $0x8] sm:$0xff]   ;;  %v1667_v21 = vld [vmem:[%s2453_s5] sm:$0xff]  }
 0x1f0   : > { %v1753_v47 = vpop.eup %1752  ;;  %1778 = vpow2.f32 %v753_v22  ;;  %v769_v28 = vadd.f32 1.0, %v1751_v23  ;;  %v2291_v22 = vld [vmem:[%s2452_s4 + $0x1] ss:$0 sm:$0xff] }
 0x1f1   : > { %v1755_v25 = vpop.eup %1754  ;;  %v791_v37 = vmul.f32 %v1753_v47, %v2189_v0 }
 0x1f2   : > { %v1757_v26 = vpop.eup %1756  ;;  %v767_v58 = vadd.f32 1.0, %v1755_v25 }
 0x1f3   : > { %v1759_v27 = vpop.eup %1758  ;;  %v794_v31 = vmul.f32 %v1757_v26, %v2193_v5 }
 0x1f4   : > { %v1761_v30 = vpop.eup %1760  ;;  %v770_v33 = vadd.f32 1.0, %v1759_v27  ;;  %1780 = vrcp.f32 %v767_v58 }
 0x1f5   : > { %v1763_v35 = vpop.eup %1762  ;;  %v792_v40 = vmul.f32 %v1761_v30, %v2197_v10  ;;  %v808_v48 = vpack.c.bf16 %v794_v31, %v793_v63 }
 0x1f6   : > { %v1765_v55 = vpop.eup %1764  ;;  %1782 = vrcp.f32 %v770_v33  ;;  %v768_v51 = vadd.f32 1.0, %v1763_v35 }
 0x1f7   : > { %v1767_v42 = vpop.eup %1766  ;;  %1784 = vrcp.f32 %v769_v28  ;;  %v807_v44 = vpack.c.bf16 %v792_v40, %v791_v37  ;;  %v797_v24 = vmul.f32 %v1765_v55, %v2201_v15 }
 0x1f8   : > { %v1769_v45 = vpop.eup %1768  ;;  %1786 = vrcp.f32 %v768_v51  ;;  %v773_v14 = vadd.f32 1.0, %v1767_v42 }
 0x1f9   : > { %v1771_v49 = vpop.eup %1770  ;;  %1538 = vmatprep.mubr.bf16.mxu0 %v807_v44  ;;  %v795_v18 = vmul.f32 %v1769_v45, %v2205_v20 }
 0x1fa   : > { %v1773_v5 = vpop.eup %1772  ;;  %v771_v52 = vadd.f32 1.0, %v1771_v49  ;;  %1539 = vmatmul.mubr.bf16.vlgmr.msra.gmra.mxu0 %v808_v48 }
 0x1fb   : > { %v1775_v0 = vpop.eup %1774  ;;  %v798_v7 = vmul.f32 %v1773_v5, %v2209_v39 }
 0x1fc   : > { %v1777_v10 = vpop.eup %1776  ;;  %v774_v53 = vadd.f32 1.0, %v1775_v0  ;;  %1788 = vrcp.f32 %v771_v52 }
 0x1fd   : > { %v1779_v61 = vpop.eup %1778  ;;  %v796_v38 = vmul.f32 %v1777_v10, %v2213_v36  ;;  %v810_v54 = vpack.c.bf16 %v798_v7, %v797_v24 }
 0x1fe   : > { %1790 = vrcp.f32 %v774_v53  ;;  %v772_v32 = vadd.f32 1.0, %v1779_v61 }
 0x1ff   : > { %1792 = vrcp.f32 %v773_v14  ;;  %v809_v46 = vpack.c.bf16 %v796_v38, %v795_v18 }
 0x200   : > { %1794 = vrcp.f32 %v772_v32 }
 0x201   : > { %1542 = vmatprep.mubr.bf16.mxu0 %v809_v46  ;;  %v1781_v57 = vpop.eup %1780 }
 0x202   : > { %1543 = vmatmul.mubr.bf16.gmra.mxu0 %v810_v54  ;;  %v799_v20 = vmul.f32 %v1781_v57, %v2221_v59 }
 0x203   : > { %v1783_v60 = vpop.eup %1782 }
 0x204   : > { %v1785_v39 = vpop.eup %1784  ;;  %v802_v62 = vmul.f32 %v1783_v60, %v2225_v41 }
 0x205   : > { %v1787_v34 = vpop.eup %1786  ;;  %v801_v15 = vmul.f32 %v1785_v39, %v2217_v29  ;;  %v1660_v29 = vld [vmem:[%s2453_s5 + $0x38] sm:$0xff]  }
 0x206   : > { %v800_v36 = vmul.f32 %v1787_v34, %v2229_v50  ;;  %1554 = vmatprep.subr.bf16.mxu0 %v1660_v29  ;;  %1586 = vmatprep.subr.bf16.mxu1 %v1660_v29 }
 0x207   : > { %v812_v4 = vpack.c.bf16 %v802_v62, %v801_v15  ;;  %1555 = vmatpush3.bf16.msra.mxu0 %v1660_v29  ;;  %1594 = vmatpush3.bf16.msra.mxu1 %v1660_v29 }
 0x208   : > { %v811_v1 = vpack.c.bf16 %v800_v36, %v799_v20 }
 0x209   : > { %v1789_v6 = vpop.eup %1788 }
 0x20a   : > { %1546 = vmatprep.mubr.bf16.mxu0 %v811_v1  ;;  %v803_v16 = vmul.f32 %v1789_v6, %v2237_v56  ;;  %v1661_v56 = vld [vmem:[%s2453_s5 + $0x30] sm:$0xff]  }
 0x20b   : > { %v1791_v8 = vpop.eup %1790  ;;  %1547 = vmatmul.mubr.bf16.gmra.mxu0 %v812_v4  ;;  %1556 = vmatprep.subr.bf16.mxu0 %v1661_v56 }
 0x20c   : > { %v1793_v9 = vpop.eup %1792  ;;  %v806_v13 = vmul.f32 %v1791_v8, %v2241_v2  ;;  %1587 = vmatprep.subr.bf16.mxu1 %v1661_v56  ;;  %1557 = vmatpush3.bf16.msra.mxu0 %v1661_v56  ;;  %v1663_v2 = vld [vmem:[%s2453_s5 + $0x20] sm:$0xff]  }
 0x20d   : > { %v1795_v11 = vpop.eup %1794  ;;  %v805_v59 = vmul.f32 %v1793_v9, %v2233_v3  ;;  %1595 = vmatpush3.bf16.msra.mxu1 %v1661_v56  ;;  %v1662_v3 = vld [vmem:[%s2453_s5 + $0x28] sm:$0xff]  }
 0x20e   : > { %v804_v41 = vmul.f32 %v1795_v11, %v2245_v12  ;;  %1558 = vmatprep.subr.bf16.mxu0 %v1662_v3  ;;  %1588 = vmatprep.subr.bf16.mxu1 %v1662_v3  ;;  %v1664_v12 = vld [vmem:[%s2453_s5 + $0x18] sm:$0xff]  }
 0x20f   : > { %v814_v50 = vpack.c.bf16 %v806_v13, %v805_v59 }
 0x210   : > { %v813_v17 = vpack.c.bf16 %v804_v41, %v803_v16  ;;  %1559 = vmatpush3.bf16.msra.mxu0 %v1662_v3 }
 0x211   : > { %1596 = vmatpush3.bf16.msra.mxu1 %v1662_v3  ;;  %1560 = vmatprep.subr.bf16.mxu0 %v1663_v2 }
 0x212   : > { %1550 = vmatprep.mubr.bf16.mxu0 %v813_v17  ;;  %1589 = vmatprep.subr.bf16.mxu1 %v1663_v2 }
 0x213   : > { %1551 = vmatmul.mubr.bf16.gmra.mxu0 %v814_v50 }
 0x214   : > { %1561 = vmatpush3.bf16.msra.mxu0 %v1663_v2 }
 0x215   : > { %1597 = vmatpush3.bf16.msra.mxu1 %v1663_v2  ;;  %1562 = vmatprep.subr.bf16.mxu0 %v1664_v12 }
 0x216   : > { %1590 = vmatprep.subr.bf16.mxu1 %v1664_v12 }
 0x218   : > { %1563 = vmatpush3.bf16.msra.mxu0 %v1664_v12 }
 0x219   : > { %1598 = vmatpush3.bf16.msra.mxu1 %v1664_v12  ;;  %1564 = vmatprep.subr.bf16.mxu0 %v1665_v19 }
 0x21a   : > { %1591 = vmatprep.subr.bf16.mxu1 %v1665_v19 }
 0x21c   : > { %1565 = vmatpush3.bf16.msra.mxu0 %v1665_v19 }
 0x21d   : > { %1599 = vmatpush3.bf16.msra.mxu1 %v1665_v19  ;;  %1566 = vmatprep.subr.bf16.mxu0 %v1666_v43 }
 0x21e   : > { %1592 = vmatprep.subr.bf16.mxu1 %v1666_v43 }
 0x220   : > { %1567 = vmatpush3.bf16.msra.mxu0 %v1666_v43 }
 0x221   : > { %1600 = vmatpush3.bf16.msra.mxu1 %v1666_v43  ;;  %1568 = vmatprep.subr.bf16.mxu0 %v1667_v21 }
 0x222   : > { %1593 = vmatprep.subr.bf16.mxu1 %v1667_v21 }
 0x224   : > { %1569 = vmatpush3.bf16.msra.mxu0 %v1667_v21 }
 0x225   : > { %1601 = vmatpush3.bf16.msra.mxu1 %v1667_v21 }
 0x2ba   : > { %v1540_v23 = vpop.f32.mrf.mxu0 }
 0x2bb   : > { %v2294_v47 = vadd.f32 %v1540_v23, %v2291_v22 }
 0x2bc   : > { %v922_v25 = vpop.f32.mrf.mxu0 }
 0x2bd   : > { %v987_v26 = vsub.f32 0.0, %v2294_v47  ;;  %v2298_v58 = vadd.f32 %v2291_v22, %v922_v25 }
 0x2be   : > { %v1541_v27 = vpop.f32.mrf.mxu0 }
 0x2bf   : > { %v1005_v28 = vmul.f32 1.442695, %v987_v26  ;;  %v985_v30 = vsub.f32 0.0, %v2298_v58  ;;  %v2302_v31 = vadd.f32 %v1541_v27, %v2291_v22 }
 0x2c0   : > { %v925_v33 = vpop.f32.mrf.mxu0 }
 0x2c1   : > { %1796 = vpow2.f32 %v1005_v28  ;;  %v1001_v35 = vmul.f32 1.442695, %v985_v30  ;;  %v988_v37 = vsub.f32 0.0, %v2302_v31  ;;  %v2306_v40 = vadd.f32 %v2291_v22, %v925_v33 }
 0x2c2   : > { %v1544_v55 = vpop.f32.mrf.mxu0 }
 0x2c3   : > { %1798 = vpow2.f32 %v1001_v35  ;;  %v1007_v63 = vmul.f32 1.442695, %v988_v37  ;;  %v986_v51 = vsub.f32 0.0, %v2306_v40  ;;  %v2310_v42 = vadd.f32 %v1544_v55, %v2291_v22 }
 0x2c4   : > { %v938_v44 = vpop.f32.mrf.mxu0 }
 0x2c5   : > { %1800 = vpow2.f32 %v1007_v63  ;;  %v1003_v45 = vmul.f32 1.442695, %v986_v51  ;;  %v991_v48 = vsub.f32 0.0, %v2310_v42  ;;  %v2314_v49 = vadd.f32 %v2291_v22, %v938_v44 }
 0x2c6   : > { %v1545_v5 = vpop.f32.mrf.mxu0 }
 0x2c7   : > { %1802 = vpow2.f32 %v1003_v45  ;;  %v1013_v52 = vmul.f32 1.442695, %v991_v48  ;;  %v989_v0 = vsub.f32 0.0, %v2314_v49  ;;  %v2318_v14 = vadd.f32 %v1545_v5, %v2291_v22 }
 0x2c8   : > { %v941_v10 = vpop.f32.mrf.mxu0 }
 0x2c9   : > { %1804 = vpow2.f32 %v1013_v52  ;;  %v1009_v7 = vmul.f32 1.442695, %v989_v0  ;;  %v992_v53 = vsub.f32 0.0, %v2318_v14  ;;  %v2322_v61 = vadd.f32 %v2291_v22, %v941_v10 }
 0x2cb   : > { %1806 = vpow2.f32 %v1009_v7  ;;  %v1015_v18 = vmul.f32 1.442695, %v992_v53  ;;  %v990_v38 = vsub.f32 0.0, %v2322_v61  ;;  %v1548_v24 = vpop.f32.mrf.mxu0 }
 0x2cc   : > { %v2326_v32 = vadd.f32 %v1548_v24, %v2291_v22 }
 0x2cd   : > { %1808 = vpow2.f32 %v1015_v18  ;;  %v1011_v46 = vmul.f32 1.442695, %v990_v38  ;;  %v954_v54 = vpop.f32.mrf.mxu0 }
 0x2ce   : > { %v1797_v57 = vpop.eup %1796  ;;  %v995_v60 = vsub.f32 0.0, %v2326_v32  ;;  %v2330_v39 = vadd.f32 %v2291_v22, %v954_v54 }
 0x2cf   : > { %v1035_v34 = vadd.f32 1.0, %v1797_v57  ;;  %1810 = vpow2.f32 %v1011_v46  ;;  %v1549_v62 = vpop.f32.mrf.mxu0 }
 0x2d0   : > { %v1799_v20 = vpop.eup %1798  ;;  %v1021_v36 = vmul.f32 1.442695, %v995_v60  ;;  %v993_v15 = vsub.f32 0.0, %v2330_v39  ;;  %v2334_v1 = vadd.f32 %v1549_v62, %v2291_v22 }
 0x2d1   : > { %1812 = vrcp.f32 %v1035_v34  ;;  %v1033_v4 = vadd.f32 1.0, %v1799_v20  ;;  %v957_v6 = vpop.f32.mrf.mxu0 }
 0x2d2   : > { %v1801_v8 = vpop.eup %1800  ;;  %1814 = vpow2.f32 %v1021_v36  ;;  %v1017_v9 = vmul.f32 1.442695, %v993_v15  ;;  %v996_v11 = vsub.f32 0.0, %v2334_v1  ;;  %v2338_v13 = vadd.f32 %v2291_v22, %v957_v6 }
 0x2d3   : > { %1816 = vrcp.f32 %v1033_v4  ;;  %v1036_v16 = vadd.f32 1.0, %v1801_v8  ;;  %v1552_v41 = vpop.f32.mrf.mxu0 }
 0x2d4   : > { %v1803_v59 = vpop.eup %1802  ;;  %1818 = vpow2.f32 %v1017_v9  ;;  %v1023_v17 = vmul.f32 1.442695, %v996_v11  ;;  %v994_v50 = vsub.f32 0.0, %v2338_v13  ;;  %v2342_v29 = vadd.f32 %v1552_v41, %v2291_v22 }
 0x2d5   : > { %1820 = vrcp.f32 %v1036_v16  ;;  %v1034_v56 = vadd.f32 1.0, %v1803_v59  ;;  %v970_v3 = vpop.f32.mrf.mxu0 }
 0x2d6   : > { %v1805_v2 = vpop.eup %1804  ;;  %1822 = vpow2.f32 %v1023_v17  ;;  %v1019_v12 = vmul.f32 1.442695, %v994_v50  ;;  %v999_v19 = vsub.f32 0.0, %v2342_v29  ;;  %v2346_v43 = vadd.f32 %v2291_v22, %v970_v3 }
 0x2d7   : > { %1824 = vrcp.f32 %v1034_v56  ;;  %v1039_v21 = vadd.f32 1.0, %v1805_v2  ;;  %v1553_v23 = vpop.f32.mrf.mxu0 }
 0x2d8   : > { %v1807_v25 = vpop.eup %1806  ;;  %1826 = vpow2.f32 %v1019_v12  ;;  %v1029_v26 = vmul.f32 1.442695, %v999_v19  ;;  %v997_v27 = vsub.f32 0.0, %v2346_v43  ;;  %v2350_v28 = vadd.f32 %v1553_v23, %v2291_v22 }
 0x2d9   : > { %1828 = vrcp.f32 %v1039_v21  ;;  %v1037_v30 = vadd.f32 1.0, %v1807_v25  ;;  %v973_v33 = vpop.f32.mrf.mxu0 }
 0x2da   : > { %v1809_v35 = vpop.eup %1808  ;;  %1830 = vpow2.f32 %v1029_v26  ;;  %v1025_v37 = vmul.f32 1.442695, %v997_v27  ;;  %v1000_v55 = vsub.f32 0.0, %v2350_v28  ;;  %v2354_v63 = vadd.f32 %v2291_v22, %v973_v33 }
 0x2db   : > { %1832 = vrcp.f32 %v1037_v30  ;;  %v1040_v51 = vadd.f32 1.0, %v1809_v35 }
 0x2dc   : > { %v1811_v44 = vpop.eup %1810  ;;  %1834 = vpow2.f32 %v1025_v37  ;;  %v1031_v45 = vmul.f32 1.442695, %v1000_v55  ;;  %v998_v48 = vsub.f32 0.0, %v2354_v63 }
 0x2dd   : > { %1836 = vrcp.f32 %v1040_v51  ;;  %v1038_v5 = vadd.f32 1.0, %v1811_v44 }
 0x2de   : > { %v1813_v52 = vpop.eup %1812  ;;  %1838 = vpow2.f32 %v1031_v45  ;;  %v1027_v0 = vmul.f32 1.442695, %v998_v48  ;;  %v1400_v45 = vld [vmem:[%s2454_s6] ss:$0 sm:$0xff] }
 0x2df   : > { %v1815_v10 = vpop.eup %1814  ;;  %1840 = vrcp.f32 %v1038_v5  ;;  %v1067_v36 = vmul.f32 %v1813_v52, %v2294_v47 }
 0x2e0   : > { %v1817_v7 = vpop.eup %1816  ;;  %1842 = vpow2.f32 %v1027_v0  ;;  %v1043_v24 = vadd.f32 1.0, %v1815_v10 }
 0x2e1   : > { %v1819_v53 = vpop.eup %1818  ;;  %v1065_v34 = vmul.f32 %v1817_v7, %v2298_v58 }
 0x2e2   : > { %v1821_v18 = vpop.eup %1820  ;;  %v1041_v22 = vadd.f32 1.0, %v1819_v53 }
 0x2e3   : > { %v1823_v38 = vpop.eup %1822  ;;  %v1068_v54 = vmul.f32 %v1821_v18, %v2302_v31 }
 0x2e4   : > { %v1825_v46 = vpop.eup %1824  ;;  %v1044_v57 = vadd.f32 1.0, %v1823_v38  ;;  %1844 = vrcp.f32 %v1041_v22 }
 0x2e5   : > { %v1827_v60 = vpop.eup %1826  ;;  %v1066_v62 = vmul.f32 %v1825_v46, %v2306_v40  ;;  %v1082_v9 = vpack.c.bf16 %v1068_v54, %v1067_v36 }
 0x2e6   : > { %v1829_v20 = vpop.eup %1828  ;;  %1846 = vrcp.f32 %v1044_v57  ;;  %v1042_v15 = vadd.f32 1.0, %v1827_v60 }
 0x2e7   : > { %v1831_v4 = vpop.eup %1830  ;;  %1848 = vrcp.f32 %v1043_v24  ;;  %v1081_v6 = vpack.c.bf16 %v1066_v62, %v1065_v34  ;;  %v1071_v3 = vmul.f32 %v1829_v20, %v2310_v42 }
 0x2e8   : > { %v1833_v8 = vpop.eup %1832  ;;  %1850 = vrcp.f32 %v1042_v15  ;;  %v1047_v41 = vadd.f32 1.0, %v1831_v4 }
 0x2e9   : > { %v1835_v11 = vpop.eup %1834  ;;  %1570 = vmatprep.mubr.bf16.mxu0 %v1081_v6  ;;  %v1069_v50 = vmul.f32 %v1833_v8, %v2314_v49 }
 0x2ea   : > { %v1837_v31 = vpop.eup %1836  ;;  %v1045_v16 = vadd.f32 1.0, %v1835_v11  ;;  %1571 = vmatmul.mubr.bf16.vlgmr.msra.gmra.mxu0 %v1082_v9 }
 0x2eb   : > { %v1839_v58 = vpop.eup %1838  ;;  %v1072_v59 = vmul.f32 %v1837_v31, %v2318_v14 }
 0x2ec   : > { %v1841_v40 = vpop.eup %1840  ;;  %v1048_v17 = vadd.f32 1.0, %v1839_v58  ;;  %1852 = vrcp.f32 %v1045_v16 }
 0x2ed   : > { %v1843_v47 = vpop.eup %1842  ;;  %v1070_v56 = vmul.f32 %v1841_v40, %v2322_v61  ;;  %v1084_v19 = vpack.c.bf16 %v1072_v59, %v1071_v3 }
 0x2ee   : > { %1854 = vrcp.f32 %v1048_v17  ;;  %v1046_v2 = vadd.f32 1.0, %v1843_v47 }
 0x2ef   : > { %1856 = vrcp.f32 %v1047_v41  ;;  %v1083_v12 = vpack.c.bf16 %v1070_v56, %v1069_v50 }
 0x2f0   : > { %1858 = vrcp.f32 %v1046_v2 }
 0x2f1   : > { %1574 = vmatprep.mubr.bf16.mxu1 %v1083_v12  ;;  %v1845_v21 = vpop.eup %1844 }
 0x2f2   : > { %1575 = vmatmul.mubr.bf16.vlgmr.msra.gmra.mxu1 %v1084_v19  ;;  %v1073_v49 = vmul.f32 %v1845_v21, %v2330_v39 }
 0x2f3   : > { %v1847_v23 = vpop.eup %1846 }
 0x2f4   : > { %v1849_v14 = vpop.eup %1848  ;;  %v1076_v26 = vmul.f32 %v1847_v23, %v2334_v1 }
 0x2f5   : > { %v1851_v25 = vpop.eup %1850  ;;  %v1075_v42 = vmul.f32 %v1849_v14, %v2326_v32 }
 0x2f6   : > { %v1074_v61 = vmul.f32 %v1851_v25, %v2338_v13 }
 0x2f7   : > { %v1086_v30 = vpack.c.bf16 %v1076_v26, %v1075_v42 }
 0x2f8   : > { %v1085_v27 = vpack.c.bf16 %v1074_v61, %v1073_v49 }
 0x2f9   : > { %v1853_v33 = vpop.eup %1852 }
 0x2fa   : > { %1578 = vmatprep.mubr.bf16.mxu1 %v1085_v27  ;;  %v1077_v1 = vmul.f32 %v1853_v33, %v2346_v43 }
 0x2fb   : > { %v1855_v35 = vpop.eup %1854  ;;  %1579 = vmatmul.mubr.bf16.gmra.mxu1 %v1086_v30 }
 0x2fc   : > { %v1857_v37 = vpop.eup %1856  ;;  %v1080_v51 = vmul.f32 %v1855_v35, %v2350_v28 }
 0x2fd   : > { %v1859_v55 = vpop.eup %1858  ;;  %v1079_v13 = vmul.f32 %v1857_v37, %v2342_v29 }
 0x2fe   : > { %v1078_v39 = vmul.f32 %v1859_v55, %v2354_v63 }
 0x2ff   : > { %v1088_v32 = vpack.c.bf16 %v1080_v51, %v1079_v13 }
 0x300   : > { %v1087_v44 = vpack.c.bf16 %v1078_v39, %v1077_v1 }
 0x302   : > { %1582 = vmatprep.mubr.bf16.mxu1 %v1087_v44 }
 0x303   : > { %1583 = vmatmul.mubr.bf16.gmra.mxu1 %v1088_v32 }
 0x3aa   : > { %v1572_v48 = vpop.f32.mrf.mxu0 }
 0x3ab   : > { %v1203_v5 = vadd.f32 %v1572_v48, %v1400_v45 }
 0x3ac   : > { %v1194_v28 = vpop.f32.mrf.mxu0 }
 0x3ad   : > { %1259 = vst [vmem:[%s2379_s22 + $0x10] sm:$0xff] %v1203_v5  ;;  %v1195_v29 = vadd.f32 %v1400_v45, %v1194_v28 }
 0x3ae   : > { %v1573_v43 = vpop.f32.mrf.mxu0 }
 0x3af   : > { %1257 = vst [vmem:[%s2379_s22] sm:$0xff] %v1195_v29  ;;  %v1206_v63 = vadd.f32 %v1573_v43, %v1400_v45 }
 0x3b0   : > { %v1197_v52 = vpop.f32.mrf.mxu0 }
 0x3b1   : > { %1260 = vst [vmem:[%s2379_s22 + $0x18] sm:$0xff] %v1206_v63  ;;  %v1198_v0 = vadd.f32 %v1400_v45, %v1197_v52 }
 0x3b2   : > { %v1576_v10 = vpop.f32.mrf.mxu1 }
 0x3b3   : > { %1258 = vst [vmem:[%s2379_s22 + $0x8] sm:$0xff] %v1198_v0  ;;  %v1219_v7 = vadd.f32 %v1576_v10, %v1400_v45 }
 0x3b4   : > { %v1210_v53 = vpop.f32.mrf.mxu1 }
 0x3b5   : > { %1263 = vst [vmem:[%s2379_s22 + $0x30] sm:$0xff] %v1219_v7  ;;  %v1211_v18 = vadd.f32 %v1400_v45, %v1210_v53 }
 0x3b6   : > { %v1577_v22 = vpop.f32.mrf.mxu1 }
 0x3b7   : > { %1261 = vst [vmem:[%s2379_s22 + $0x20] sm:$0xff] %v1211_v18  ;;  %v1222_v38 = vadd.f32 %v1577_v22, %v1400_v45 }
 0x3b8   : > { %v1213_v24 = vpop.f32.mrf.mxu1 }
 0x3b9   : > { %1264 = vst [vmem:[%s2379_s22 + $0x38] sm:$0xff] %v1222_v38  ;;  %v1214_v46 = vadd.f32 %v1400_v45, %v1213_v24 }
 0x3bb   : > { %1262 = vst [vmem:[%s2379_s22 + $0x28] sm:$0xff] %v1214_v46  ;;  %v1580_v54 = vpop.f32.mrf.mxu1 }
 0x3bc   : > { %v1235_v57 = vadd.f32 %v1580_v54, %v1400_v45 }
 0x3bd   : > { %v1226_v60 = vpop.f32.mrf.mxu1 }
 0x3be   : > { %1267 = vst [vmem:[%s2379_s22 + $0x50] sm:$0xff] %v1235_v57  ;;  %v1227_v34 = vadd.f32 %v1400_v45, %v1226_v60 }
 0x3bf   : > { %v1581_v62 = vpop.f32.mrf.mxu1 }
 0x3c0   : > { %1265 = vst [vmem:[%s2379_s22 + $0x40] sm:$0xff] %v1227_v34  ;;  %v1238_v20 = vadd.f32 %v1581_v62, %v1400_v45 }
 0x3c1   : > { %v1229_v36 = vpop.f32.mrf.mxu1 }
 0x3c2   : > { %1268 = vst [vmem:[%s2379_s22 + $0x58] sm:$0xff] %v1238_v20  ;;  %v1230_v15 = vadd.f32 %v1400_v45, %v1229_v36 }
 0x3c3   : > { %v1584_v4 = vpop.f32.mrf.mxu1 }
 0x3c4   : > { %1266 = vst [vmem:[%s2379_s22 + $0x48] sm:$0xff] %v1230_v15  ;;  %v1251_v6 = vadd.f32 %v1584_v4, %v1400_v45 }
 0x3c5   : > { %v1242_v8 = vpop.f32.mrf.mxu1 }
 0x3c6   : > { %1271 = vst [vmem:[%s2379_s22 + $0x70] sm:$0xff] %v1251_v6  ;;  %v1243_v9 = vadd.f32 %v1400_v45, %v1242_v8 }
 0x3c7   : > { %v1585_v11 = vpop.f32.mrf.mxu1 }
 0x3c8   : > { %1269 = vst [vmem:[%s2379_s22 + $0x60] sm:$0xff] %v1243_v9  ;;  %v1254_v31 = vadd.f32 %v1585_v11, %v1400_v45 }
 0x3c9   : > { %v1245_v16 = vpop.f32.mrf.mxu1 }
 0x3ca   : > { %1272 = vst [vmem:[%s2379_s22 + $0x78] sm:$0xff] %v1254_v31  ;;  %v1246_v58 = vadd.f32 %v1400_v45, %v1245_v16 }
 0x3cc   : > { %1270 = vst [vmem:[%s2379_s22 + $0x68] sm:$0xff] %v1246_v58 }
 0x3cd   : > { %1873 = shalt.err (!%p1870_p3)
}
 0x3ce   : > { %s1874_s18 = scalar_lea.hbm %s2400_s13, 2048  ;;  %s1878_s21 = scalar_lea.hbm %s2455_s7, 4096 }
 0x3cf   : > { %p1875_p4 = scmp.ne.s32.totalorder %s2400_s13, %s1874_s18  ;;  %p1879_p9 = scmp.lt.s32.totalorder %s2400_s13, %s2455_s7 }
 0x3d0   : > { %p1880_p10 = scmp.lt.s32.totalorder %s1878_s21, %s1874_s18 }
 0x3d1   : > { %p1876_p7 = pnand %p1875_p4, %p2003_p5 }
 0x3d2   : > { %p1881_p11 = por %p1880_p10, %p1879_p9 }
 0x3d3   : > { %p1877_p8 = pneg %p1876_p7 }
 0x3d5   : > { %p1882_p12 = pnand %p1881_p11, %p1877_p8 }
 0x3d7   : > { %1885 = shalt.err (!%p1882_p12)
}
 0x3d8   : > { %s1923_s8 = smov 128   ;;  %s1924_s9 = smov 8  }
 0x3d9   : > { %1603 = dma.vmem_to_hbm [thread:$0]  (%p2003_p5), %s2402_s29, 2048, %s2400_s13, %s2408_s28, %s1923_s8, %s1923_s8, %s1924_s9  }
 0x3da PF: > { %p1609_p13 = scmp.ge.s32.totalorder %s1920_s27, 2  ;;  %s1302_s14 = sand.u32 1, %s1908_s24  }
 0x3db   : > { %s1303_s15 = scalar_lea.sflag [#allocation3], %s1302_s14 }
 0x3dc   : > { %p1606_p0 = pnand %p1609_p13, %p2007_p6 }
 0x3de   : > { %p1607_p1 = pneg %p1606_p0 }
 0x3e0   : > { %1903 = dma.done.wait (%p1607_p1), %s1303_s15, 2048  }
 0x3e1   : > { %1905 = vsyncadd (%p1607_p1), %s1303_s15, 4294965248  ;;  %p17_p2 = scmp.ge.s32.totalorder %s1990_s30, 4   ;;  %s2458_s24 = smov %s1912_s25 }
 0x3e2   : > { %s2459_s25 = smov %s1916_s26  ;;  %s2460_s26 = smov %s2001_s10 }
 0x3e3   : > { %s2461_s27 = smov %s1990_s30  ;;  %19 = sbr.rel (!%p17_p2) target bundleno = 3 (0x3), region = 85 }
 0x3e8   :  { %1308 = vsyncpa [#allocation3], 1 }
 0x3e9   :  { %1310 = vsyncpa [#allocation3 + $0x1], 1 }

</bundles_post_ra>
